<compile_context>
chip_gen: v5e
topology: v5e:2x2
jax: 0.10.0
libtpu: 0.0.40
codegen_flags: <defaults>
</compile_context>

<pallas_src>
import functools
import math

import jax
import jax.numpy as jnp
from jax.experimental import pallas as pl
from jax.experimental.pallas import tpu as pltpu

# ----------------------------------------------------------------------------
# Small DistilBERT-like config (real model: vocab=30522, H=768, heads=12,
# ffn=3072, layers=6 — shrunk to keep the synthetic example tiny).
# ----------------------------------------------------------------------------
VOCAB = 100
MAX_POS = 16
HIDDEN = 64
N_HEADS = 4
HEAD_DIM = HIDDEN // N_HEADS
FFN = 128
N_LAYERS = 3
LN_EPS = 1e-12


def _layernorm(x, gamma, beta, eps=LN_EPS):
    mu = jnp.mean(x, axis=-1, keepdims=True)
    var = jnp.mean((x - mu) ** 2, axis=-1, keepdims=True)
    return (x - mu) * jax.lax.rsqrt(var + eps) * gamma + beta


def _gelu(x):
    # TODO(synk): DistilBERT uses exact erf-GELU; tanh approximation is used
    # because erf lowering is not guaranteed in Mosaic.
    return jax.nn.gelu(x, approximate=True)


# ----------------------------------------------------------------------------
# Fused kernel: embedding LayerNorm + (N_LAYERS - 1) transformer layers,
# returning only the [CLS] embedding of the second-to-last hidden state.
# ----------------------------------------------------------------------------
def fused_distilbert_kernel(batch, seq, n_used,
                            emb_ref, bias_ref, eg_ref, eb_ref,
                            wqkv_ref, bqkv_ref, wo_ref, bo_ref,
                            g1_ref, be1_ref, w1_ref, b1_ref,
                            w2_ref, b2_ref, g2_ref, be2_ref,
                            out_ref):
    B, S = batch, seq
    H, NH, HD = HIDDEN, N_HEADS, HEAD_DIM
    bf16 = jnp.bfloat16

    # Embedding LayerNorm over the whole (B*S, H) slab.
    x = _layernorm(emb_ref[...].astype(jnp.float32), eg_ref[...], eb_ref[...])

    # Head-batched additive attention-mask bias (NH*B, 1, S), hoisted once.
    bias = bias_ref[...]

    def split_heads(t):
        # (B*S, H) -> (NH*B, S, HD); head-major batch index = h*B + b.
        # Lane slices + leading-axis concat only (no 4-D transposes).
        return jnp.concatenate(
            [t[:, h * HD:(h + 1) * HD].reshape(B, S, HD) for h in range(NH)],
            axis=0)

    def merge_heads(t):
        # (NH*B, S, HD) -> (B*S, NH*HD) lane-dense, matching Wo's row order.
        return jnp.concatenate(
            [t[h * B:(h + 1) * B].reshape(B * S, HD) for h in range(NH)],
            axis=-1)

    # TODO(synk): at real scale convert this static unroll into a grid axis /
    # lax.fori_loop so vreg live ranges stay bounded.
    for l in range(n_used):
        xb = x.astype(bf16)                                   # (B*S, H)

        # Fused QKV projection: one lane-dense matmul per layer.
        # (Attention 1/sqrt(HD) scale is folded into Wq/bq wrapper-side.)
        qkv = jnp.dot(xb, wqkv_ref[l],
                      preferred_element_type=jnp.float32) + bqkv_ref[l]
        qkv = qkv.astype(bf16)                                # (B*S, 3H)

        q = split_heads(qkv[:, 0 * H:1 * H])                  # (NH*B, S, HD)
        k = split_heads(qkv[:, 1 * H:2 * H])
        v = split_heads(qkv[:, 2 * H:3 * H])

        # Batched attention over (heads x batch) — one MXU call per einsum.
        scores = jnp.einsum('bqd,bkd->bqk', q, k,
                            preferred_element_type=jnp.float32)   # (NH*B,S,S)
        probs = jax.nn.softmax(scores + bias, axis=-1)
        ctx = jnp.einsum('bqk,bkd->bqd', probs.astype(bf16), v,
                         preferred_element_type=jnp.float32)      # (NH*B,S,HD)

        # Single lane-dense output projection with Wo in (H, H) layout.
        ctx_flat = merge_heads(ctx).astype(bf16)              # (B*S, H)
        attn_out = jnp.dot(ctx_flat, wo_ref[l],
                           preferred_element_type=jnp.float32) + bo_ref[l]

        sa = _layernorm(attn_out + x, g1_ref[l], be1_ref[l])

        h1 = _gelu(jnp.dot(sa.astype(bf16), w1_ref[l],
                           preferred_element_type=jnp.float32) + b1_ref[l])
        ffn = jnp.dot(h1.astype(bf16), w2_ref[l],
                      preferred_element_type=jnp.float32) + b2_ref[l]
        x = _layernorm(ffn + sa, g2_ref[l], be2_ref[l])

    # x is hidden_states[-2] (flattened).  Only the [CLS] row of each sequence
    # is consumed downstream -> free reshape + sublane pick, (B, H) writeback.
    out_ref[...] = x.reshape(B, S, H)[:, 0, :].astype(out_ref.dtype)


# ----------------------------------------------------------------------------
# Deterministic parameter init (synthetic stand-in for the pretrained weights)
# ----------------------------------------------------------------------------
def init_params(key):
    scale = 0.02
    keys = iter(jax.random.split(key, 8 + 12 * N_LAYERS))

    def rnd(shape):
        return (scale * jax.random.normal(next(keys), shape)).astype(jnp.float32)

    params = {
        "word_emb": rnd((VOCAB, HIDDEN)),
        "pos_emb": rnd((MAX_POS, HIDDEN)),
        "emb_ln_g": jnp.ones((1, HIDDEN), jnp.float32),
        "emb_ln_b": jnp.zeros((1, HIDDEN), jnp.float32),
        "layers": [],
    }
    for _ in range(N_LAYERS):
        layer = (
            rnd((HIDDEN, HIDDEN)), rnd((1, HIDDEN)),      # Wq, bq
            rnd((HIDDEN, HIDDEN)), rnd((1, HIDDEN)),      # Wk, bk
            rnd((HIDDEN, HIDDEN)), rnd((1, HIDDEN)),      # Wv, bv
            rnd((HIDDEN, HIDDEN)), rnd((1, HIDDEN)),      # Wo, bo
            jnp.ones((1, HIDDEN), jnp.float32), jnp.zeros((1, HIDDEN), jnp.float32),
            rnd((HIDDEN, FFN)), rnd((1, FFN)),            # W1, b1
            rnd((FFN, HIDDEN)), rnd((1, HIDDEN)),         # W2, b2
            jnp.ones((1, HIDDEN), jnp.float32), jnp.zeros((1, HIDDEN), jnp.float32),
        )
        params["layers"].append(layer)

    # Present in __init__ but unused in forward (kept for structural fidelity):
    params["pre_classifier_w"] = rnd((HIDDEN, HIDDEN))
    params["pre_classifier_b"] = rnd((1, HIDDEN))
    params["classifier_w"] = rnd((HIDDEN, 2))
    params["classifier_b"] = rnd((1, 2))
    return params


# ----------------------------------------------------------------------------
# Forward pass equivalent to DistillBERT_Emb.forward(input_ids, attention_mask)
# ----------------------------------------------------------------------------
def distilbert_emb_forward(params, input_ids, attention_mask):
    B, S = input_ids.shape
    H, NH, HD = HIDDEN, N_HEADS, HEAD_DIM
    # hidden_states[-2] is the output of layer N_LAYERS-1, so the final layer's
    # attention + FFN are dead work — skip them entirely.
    L = N_LAYERS - 1

    # Embedding gather — glue in plain JAX.
    # TODO(synk): at real (B,S,H) fold the gather into the kernel via
    # PrefetchScalarGridSpec + pl.Element row-gather to avoid the HBM round-trip.
    emb = params["word_emb"][input_ids] + params["pos_emb"][jnp.arange(S)][None, :, :]
    emb_flat = emb.reshape(B * S, H).astype(jnp.float32)

    # Additive attention-mask bias, pre-broadcast to the head-batched layout
    # used inside the kernel: (NH*B, 1, S), batch index = h*B + b.
    mask_bias = (1.0 - attention_mask.astype(jnp.float32)) * -1e9      # (B, S)
    bias_hb = jnp.broadcast_to(mask_bias[None, :, None, :],
                               (NH, B, 1, S)).reshape(NH * B, 1, S)

    layers = params["layers"][:L]

    def stk(i):
        return jnp.stack([lp[i] for lp in layers])

    bf16 = jnp.bfloat16
    inv = 1.0 / math.sqrt(HD)
    # Lane-dense fused QKV weights; attention scale folded into Wq / bq (free).
    wqkv = jnp.concatenate([stk(0) * inv, stk(2), stk(4)], axis=-1).astype(bf16)  # (L,H,3H)
    bqkv = jnp.concatenate([stk(1) * inv, stk(3), stk(5)], axis=-1)               # (L,1,3H)
    wo = stk(6).astype(bf16)                                                      # (L,H,H)
    bo = stk(7)                                                                   # (L,1,H)
    g1, be1 = stk(8), stk(9)                                                      # (L,1,H)
    w1 = stk(10).astype(bf16)                                                     # (L,H,FFN)
    b1 = stk(11)                                                                  # (L,1,FFN)
    w2 = stk(12).astype(bf16)                                                     # (L,FFN,H)
    b2 = stk(13)                                                                  # (L,1,H)
    g2, be2 = stk(14), stk(15)                                                    # (L,1,H)

    operands = (emb_flat, bias_hb,
                params["emb_ln_g"], params["emb_ln_b"],
                wqkv, bqkv, wo, bo, g1, be1,
                w1, b1, w2, b2, g2, be2)

    def fullspec(a):
        nd = a.ndim
        return pl.BlockSpec(a.shape, lambda i, _nd=nd: (0,) * _nd)

    kernel = functools.partial(fused_distilbert_kernel, B, S, L)
    # At this toy size everything fits comfortably in the default scoped VMEM;
    # at real scale set vmem_limit_bytes and stream layer weights per grid step.
    return pl.pallas_call(
        kernel,
        out_shape=jax.ShapeDtypeStruct((B, H), jnp.float32),
        grid=(1,),
        in_specs=[fullspec(a) for a in operands],
        out_specs=pl.BlockSpec((B, H), lambda i: (0, 0)),
        compiler_params=pltpu.CompilerParams(
            dimension_semantics=("arbitrary",),
        ),
    )(*operands)


if __name__ == "__main__":
    key = jax.random.PRNGKey(0)
    pkey, ikey = jax.random.split(key)
    params = init_params(pkey)

    B, S = 2, 8
    input_ids = jax.random.randint(ikey, (B, S), 0, VOCAB, dtype=jnp.int32)
    attention_mask = jnp.array(
        [[1, 1, 1, 1, 1, 1, 1, 1],
         [1, 1, 1, 1, 1, 1, 0, 0]], dtype=jnp.int32)

    out = distilbert_emb_forward(params, input_ids, attention_mask)
    out = jax.block_until_ready(out)
    assert out.shape == (B, HIDDEN) and out.dtype == jnp.float32
    print("KERNEL_OK")
</pallas_src>

<mosaic_0001>
module attributes {stable_mosaic.version = 11 : i64} {
  func.func @fused_distilbert_kernel(%arg0: i32, %arg1: memref<16x64xf32, #tpu.memory_space<vmem>>, %arg2: memref<8x1x8xf32, #tpu.memory_space<vmem>>, %arg3: memref<1x64xf32, #tpu.memory_space<vmem>>, %arg4: memref<1x64xf32, #tpu.memory_space<vmem>>, %arg5: memref<2x64x192xbf16, #tpu.memory_space<vmem>>, %arg6: memref<2x1x192xf32, #tpu.memory_space<vmem>>, %arg7: memref<2x64x64xbf16, #tpu.memory_space<vmem>>, %arg8: memref<2x1x64xf32, #tpu.memory_space<vmem>>, %arg9: memref<2x1x64xf32, #tpu.memory_space<vmem>>, %arg10: memref<2x1x64xf32, #tpu.memory_space<vmem>>, %arg11: memref<2x64x128xbf16, #tpu.memory_space<vmem>>, %arg12: memref<2x1x128xf32, #tpu.memory_space<vmem>>, %arg13: memref<2x128x64xbf16, #tpu.memory_space<vmem>>, %arg14: memref<2x1x64xf32, #tpu.memory_space<vmem>>, %arg15: memref<2x1x64xf32, #tpu.memory_space<vmem>>, %arg16: memref<2x1x64xf32, #tpu.memory_space<vmem>>, %arg17: memref<2x64xf32, #tpu.memory_space<vmem>>) attributes {dimension_semantics = [#tpu.dimension_semantics<arbitrary>], iteration_bounds = array<i64: 1>, scalar_prefetch = 0 : i64, scratch_operands = 0 : i64, tpu.core_type = #tpu.core_type<tc>, window_params = [{pipeline_mode = #tpu.pipeline_mode<synchronous>, transform_indices = @transform_0, window_bounds = array<i64: 16, 64>}, {pipeline_mode = #tpu.pipeline_mode<synchronous>, transform_indices = @transform_1, window_bounds = array<i64: 8, 1, 8>}, {pipeline_mode = #tpu.pipeline_mode<synchronous>, transform_indices = @transform_2, window_bounds = array<i64: 1, 64>}, {pipeline_mode = #tpu.pipeline_mode<synchronous>, transform_indices = @transform_3, window_bounds = array<i64: 1, 64>}, {pipeline_mode = #tpu.pipeline_mode<synchronous>, transform_indices = @transform_4, window_bounds = array<i64: 2, 64, 192>}, {pipeline_mode = #tpu.pipeline_mode<synchronous>, transform_indices = @transform_5, window_bounds = array<i64: 2, 1, 192>}, {pipeline_mode = #tpu.pipeline_mode<synchronous>, transform_indices = @transform_6, window_bounds = array<i64: 2, 64, 64>}, {pipeline_mode = #tpu.pipeline_mode<synchronous>, transform_indices = @transform_7, window_bounds = array<i64: 2, 1, 64>}, {pipeline_mode = #tpu.pipeline_mode<synchronous>, transform_indices = @transform_8, window_bounds = array<i64: 2, 1, 64>}, {pipeline_mode = #tpu.pipeline_mode<synchronous>, transform_indices = @transform_9, window_bounds = array<i64: 2, 1, 64>}, {pipeline_mode = #tpu.pipeline_mode<synchronous>, transform_indices = @transform_10, window_bounds = array<i64: 2, 64, 128>}, {pipeline_mode = #tpu.pipeline_mode<synchronous>, transform_indices = @transform_11, window_bounds = array<i64: 2, 1, 128>}, {pipeline_mode = #tpu.pipeline_mode<synchronous>, transform_indices = @transform_12, window_bounds = array<i64: 2, 128, 64>}, {pipeline_mode = #tpu.pipeline_mode<synchronous>, transform_indices = @transform_13, window_bounds = array<i64: 2, 1, 64>}, {pipeline_mode = #tpu.pipeline_mode<synchronous>, transform_indices = @transform_14, window_bounds = array<i64: 2, 1, 64>}, {pipeline_mode = #tpu.pipeline_mode<synchronous>, transform_indices = @transform_15, window_bounds = array<i64: 2, 1, 64>}, {pipeline_mode = #tpu.pipeline_mode<synchronous>, transform_indices = @transform_16, window_bounds = array<i64: 2, 64>}]} {
    %c0 = arith.constant 0 : index
    %c0_0 = arith.constant 0 : index
    %0 = vector.load %arg1[%c0, %c0_0] : memref<16x64xf32, #tpu.memory_space<vmem>>, vector<16x64xf32>
    %c0_1 = arith.constant 0 : index
    %c0_2 = arith.constant 0 : index
    %1 = vector.load %arg3[%c0_1, %c0_2] : memref<1x64xf32, #tpu.memory_space<vmem>>, vector<1x64xf32>
    %c0_3 = arith.constant 0 : index
    %c0_4 = arith.constant 0 : index
    %2 = vector.load %arg4[%c0_3, %c0_4] : memref<1x64xf32, #tpu.memory_space<vmem>>, vector<1x64xf32>
    %cst = arith.constant dense<0.000000e+00> : vector<16xf32>
    %3 = vector.multi_reduction <add>, %0, %cst [1] : vector<16x64xf32> to vector<16xf32>
    %4 = vector.shape_cast %3 : vector<16xf32> to vector<16x1xf32>
    %cst_5 = arith.constant 6.400000e+01 : f32
    %5 = vector.broadcast %cst_5 : f32 to vector<16x1xf32>
    %6 = arith.divf %4, %5 : vector<16x1xf32>
    %7 = vector.broadcast %6 : vector<16x1xf32> to vector<16x64xf32>
    %8 = arith.subf %0, %7 : vector<16x64xf32>
    %9 = arith.mulf %8, %8 : vector<16x64xf32>
    %cst_6 = arith.constant dense<0.000000e+00> : vector<16xf32>
    %10 = vector.multi_reduction <add>, %9, %cst_6 [1] : vector<16x64xf32> to vector<16xf32>
    %11 = vector.shape_cast %10 : vector<16xf32> to vector<16x1xf32>
    %cst_7 = arith.constant 6.400000e+01 : f32
    %12 = vector.broadcast %cst_7 : f32 to vector<16x1xf32>
    %13 = arith.divf %11, %12 : vector<16x1xf32>
    %14 = vector.broadcast %6 : vector<16x1xf32> to vector<16x64xf32>
    %15 = arith.subf %0, %14 : vector<16x64xf32>
    %cst_8 = arith.constant 9.99999996E-13 : f32
    %16 = vector.broadcast %cst_8 : f32 to vector<16x1xf32>
    %17 = arith.addf %13, %16 : vector<16x1xf32>
    %18 = math.rsqrt %17 : vector<16x1xf32>
    %19 = vector.broadcast %18 : vector<16x1xf32> to vector<16x64xf32>
    %20 = arith.mulf %15, %19 : vector<16x64xf32>
    %21 = vector.broadcast %1 : vector<1x64xf32> to vector<16x64xf32>
    %22 = arith.mulf %20, %21 : vector<16x64xf32>
    %23 = vector.broadcast %2 : vector<1x64xf32> to vector<16x64xf32>
    %24 = arith.addf %22, %23 : vector<16x64xf32>
    %c0_9 = arith.constant 0 : index
    %c0_10 = arith.constant 0 : index
    %c0_11 = arith.constant 0 : index
    %25 = vector.load %arg2[%c0_9, %c0_10, %c0_11] : memref<8x1x8xf32, #tpu.memory_space<vmem>>, vector<8x1x8xf32>
    %26 = arith.truncf %24 : vector<16x64xf32> to vector<16x64xbf16>
    %c0_12 = arith.constant 0 : index
    %c0_13 = arith.constant 0 : index
    %c0_14 = arith.constant 0 : index
    %27 = vector.load %arg5[%c0_12, %c0_13, %c0_14] : memref<2x64x192xbf16, #tpu.memory_space<vmem>>, vector<1x64x192xbf16>
    %28 = vector.shape_cast %27 : vector<1x64x192xbf16> to vector<64x192xbf16>
    %cst_15 = arith.constant dense<0.000000e+00> : vector<16x192xf32>
    %29 = tpu.matmul %26, %28, %cst_15 {dimension_numbers = #tpu.dot_dimension_numbers<[1], [0], [0], [1], [0, 0, 1, 1], [], []>} : vector<16x64xbf16>, vector<64x192xbf16>, vector<16x192xf32> -> vector<16x192xf32>
    %c0_16 = arith.constant 0 : index
    %c0_17 = arith.constant 0 : index
    %c0_18 = arith.constant 0 : index
    %30 = vector.load %arg6[%c0_16, %c0_17, %c0_18] : memref<2x1x192xf32, #tpu.memory_space<vmem>>, vector<1x1x192xf32>
    %31 = vector.shape_cast %30 : vector<1x1x192xf32> to vector<1x192xf32>
    %32 = vector.broadcast %31 : vector<1x192xf32> to vector<16x192xf32>
    %33 = arith.addf %29, %32 : vector<16x192xf32>
    %34 = arith.truncf %33 : vector<16x192xf32> to vector<16x192xbf16>
    %35 = vector.extract_strided_slice %34 {offsets = [0, 0], sizes = [16, 64], strides = [1, 1]} : vector<16x192xbf16> to vector<16x64xbf16>
    %36 = vector.extract_strided_slice %35 {offsets = [0, 0], sizes = [16, 16], strides = [1, 1]} : vector<16x64xbf16> to vector<16x16xbf16>
    %37 = vector.shape_cast %36 : vector<16x16xbf16> to vector<2x8x16xbf16>
    %38 = vector.extract_strided_slice %35 {offsets = [0, 16], sizes = [16, 16], strides = [1, 1]} : vector<16x64xbf16> to vector<16x16xbf16>
    %39 = vector.shape_cast %38 : vector<16x16xbf16> to vector<2x8x16xbf16>
    %40 = vector.extract_strided_slice %35 {offsets = [0, 32], sizes = [16, 16], strides = [1, 1]} : vector<16x64xbf16> to vector<16x16xbf16>
    %41 = vector.shape_cast %40 : vector<16x16xbf16> to vector<2x8x16xbf16>
    %42 = vector.extract_strided_slice %35 {offsets = [0, 48], sizes = [16, 16], strides = [1, 1]} : vector<16x64xbf16> to vector<16x16xbf16>
    %43 = vector.shape_cast %42 : vector<16x16xbf16> to vector<2x8x16xbf16>
    %44 = tpu.concatenate %37, %39, %41, %43 in 0 : vector<2x8x16xbf16>, vector<2x8x16xbf16>, vector<2x8x16xbf16>, vector<2x8x16xbf16> -> vector<8x8x16xbf16>
    %45 = vector.extract_strided_slice %34 {offsets = [0, 64], sizes = [16, 64], strides = [1, 1]} : vector<16x192xbf16> to vector<16x64xbf16>
    %46 = vector.extract_strided_slice %45 {offsets = [0, 0], sizes = [16, 16], strides = [1, 1]} : vector<16x64xbf16> to vector<16x16xbf16>
    %47 = vector.shape_cast %46 : vector<16x16xbf16> to vector<2x8x16xbf16>
    %48 = vector.extract_strided_slice %45 {offsets = [0, 16], sizes = [16, 16], strides = [1, 1]} : vector<16x64xbf16> to vector<16x16xbf16>
    %49 = vector.shape_cast %48 : vector<16x16xbf16> to vector<2x8x16xbf16>
    %50 = vector.extract_strided_slice %45 {offsets = [0, 32], sizes = [16, 16], strides = [1, 1]} : vector<16x64xbf16> to vector<16x16xbf16>
    %51 = vector.shape_cast %50 : vector<16x16xbf16> to vector<2x8x16xbf16>
    %52 = vector.extract_strided_slice %45 {offsets = [0, 48], sizes = [16, 16], strides = [1, 1]} : vector<16x64xbf16> to vector<16x16xbf16>
    %53 = vector.shape_cast %52 : vector<16x16xbf16> to vector<2x8x16xbf16>
    %54 = tpu.concatenate %47, %49, %51, %53 in 0 : vector<2x8x16xbf16>, vector<2x8x16xbf16>, vector<2x8x16xbf16>, vector<2x8x16xbf16> -> vector<8x8x16xbf16>
    %55 = vector.extract_strided_slice %34 {offsets = [0, 128], sizes = [16, 64], strides = [1, 1]} : vector<16x192xbf16> to vector<16x64xbf16>
    %56 = vector.extract_strided_slice %55 {offsets = [0, 0], sizes = [16, 16], strides = [1, 1]} : vector<16x64xbf16> to vector<16x16xbf16>
    %57 = vector.shape_cast %56 : vector<16x16xbf16> to vector<2x8x16xbf16>
    %58 = vector.extract_strided_slice %55 {offsets = [0, 16], sizes = [16, 16], strides = [1, 1]} : vector<16x64xbf16> to vector<16x16xbf16>
    %59 = vector.shape_cast %58 : vector<16x16xbf16> to vector<2x8x16xbf16>
    %60 = vector.extract_strided_slice %55 {offsets = [0, 32], sizes = [16, 16], strides = [1, 1]} : vector<16x64xbf16> to vector<16x16xbf16>
    %61 = vector.shape_cast %60 : vector<16x16xbf16> to vector<2x8x16xbf16>
    %62 = vector.extract_strided_slice %55 {offsets = [0, 48], sizes = [16, 16], strides = [1, 1]} : vector<16x64xbf16> to vector<16x16xbf16>
    %63 = vector.shape_cast %62 : vector<16x16xbf16> to vector<2x8x16xbf16>
    %64 = tpu.concatenate %57, %59, %61, %63 in 0 : vector<2x8x16xbf16>, vector<2x8x16xbf16>, vector<2x8x16xbf16>, vector<2x8x16xbf16> -> vector<8x8x16xbf16>
    "tpu.trace_start"() <{level = 10 : i32, message = "bqd,bkd->bqk"}> : () -> ()
    %cst_19 = arith.constant dense<0.000000e+00> : vector<8x8x8xf32>
    %65 = tpu.matmul %44, %54, %cst_19 {dimension_numbers = #tpu.dot_dimension_numbers<[2], [2], [1], [1], [0, 0, 0, 1, 1, 1], [0], [0]>} : vector<8x8x16xbf16>, vector<8x8x16xbf16>, vector<8x8x8xf32> -> vector<8x8x8xf32>
    "tpu.trace_stop"() : () -> ()
    %66 = vector.broadcast %25 : vector<8x1x8xf32> to vector<8x8x8xf32>
    %67 = arith.addf %65, %66 : vector<8x8x8xf32>
    %cst_20 = arith.constant dense<0xFF800000> : vector<8x8xf32>
    %68 = vector.multi_reduction <maximumf>, %67, %cst_20 [2] : vector<8x8x8xf32> to vector<8x8xf32>
    %cst_21 = arith.constant 0xFF800000 : f32
    %69 = vector.broadcast %cst_21 : f32 to vector<8x8xf32>
    %70 = arith.maximumf %69, %68 : vector<8x8xf32>
    %71 = vector.shape_cast %70 : vector<8x8xf32> to vector<8x8x1xf32>
    %72 = vector.broadcast %71 : vector<8x8x1xf32> to vector<8x8x8xf32>
    %73 = arith.subf %67, %72 : vector<8x8x8xf32>
    %74 = math.exp %73 : vector<8x8x8xf32>
    %cst_22 = arith.constant dense<0.000000e+00> : vector<8x8xf32>
    %75 = vector.multi_reduction <add>, %74, %cst_22 [2] : vector<8x8x8xf32> to vector<8x8xf32>
    %76 = vector.shape_cast %75 : vector<8x8xf32> to vector<8x8x1xf32>
    %77 = vector.broadcast %76 : vector<8x8x1xf32> to vector<8x8x8xf32>
    %78 = arith.divf %74, %77 : vector<8x8x8xf32>
    %79 = arith.truncf %78 : vector<8x8x8xf32> to vector<8x8x8xbf16>
    "tpu.trace_start"() <{level = 10 : i32, message = "bqk,bkd->bqd"}> : () -> ()
    %cst_23 = arith.constant dense<0.000000e+00> : vector<8x8x16xf32>
    %80 = tpu.matmul %79, %64, %cst_23 {dimension_numbers = #tpu.dot_dimension_numbers<[2], [1], [1], [2], [0, 0, 0, 1, 1, 2], [0], [0]>} : vector<8x8x8xbf16>, vector<8x8x16xbf16>, vector<8x8x16xf32> -> vector<8x8x16xf32>
    "tpu.trace_stop"() : () -> ()
    %81 = vector.extract_strided_slice %80 {offsets = [0, 0, 0], sizes = [2, 8, 16], strides = [1, 1, 1]} : vector<8x8x16xf32> to vector<2x8x16xf32>
    %82 = vector.shape_cast %81 : vector<2x8x16xf32> to vector<16x16xf32>
    %83 = vector.extract_strided_slice %80 {offsets = [2, 0, 0], sizes = [2, 8, 16], strides = [1, 1, 1]} : vector<8x8x16xf32> to vector<2x8x16xf32>
    %84 = vector.shape_cast %83 : vector<2x8x16xf32> to vector<16x16xf32>
    %85 = vector.extract_strided_slice %80 {offsets = [4, 0, 0], sizes = [2, 8, 16], strides = [1, 1, 1]} : vector<8x8x16xf32> to vector<2x8x16xf32>
    %86 = vector.shape_cast %85 : vector<2x8x16xf32> to vector<16x16xf32>
    %87 = vector.extract_strided_slice %80 {offsets = [6, 0, 0], sizes = [2, 8, 16], strides = [1, 1, 1]} : vector<8x8x16xf32> to vector<2x8x16xf32>
    %88 = vector.shape_cast %87 : vector<2x8x16xf32> to vector<16x16xf32>
    %89 = tpu.concatenate %82, %84, %86, %88 in 1 : vector<16x16xf32>, vector<16x16xf32>, vector<16x16xf32>, vector<16x16xf32> -> vector<16x64xf32>
    %90 = arith.truncf %89 : vector<16x64xf32> to vector<16x64xbf16>
    %c0_24 = arith.constant 0 : index
    %c0_25 = arith.constant 0 : index
    %c0_26 = arith.constant 0 : index
    %91 = vector.load %arg7[%c0_24, %c0_25, %c0_26] : memref<2x64x64xbf16, #tpu.memory_space<vmem>>, vector<1x64x64xbf16>
    %92 = vector.shape_cast %91 : vector<1x64x64xbf16> to vector<64x64xbf16>
    %cst_27 = arith.constant dense<0.000000e+00> : vector<16x64xf32>
    %93 = tpu.matmul %90, %92, %cst_27 {dimension_numbers = #tpu.dot_dimension_numbers<[1], [0], [0], [1], [0, 0, 1, 1], [], []>} : vector<16x64xbf16>, vector<64x64xbf16>, vector<16x64xf32> -> vector<16x64xf32>
    %c0_28 = arith.constant 0 : index
    %c0_29 = arith.constant 0 : index
    %c0_30 = arith.constant 0 : index
    %94 = vector.load %arg8[%c0_28, %c0_29, %c0_30] : memref<2x1x64xf32, #tpu.memory_space<vmem>>, vector<1x1x64xf32>
    %95 = vector.shape_cast %94 : vector<1x1x64xf32> to vector<1x64xf32>
    %96 = vector.broadcast %95 : vector<1x64xf32> to vector<16x64xf32>
    %97 = arith.addf %93, %96 : vector<16x64xf32>
    %98 = arith.addf %97, %24 : vector<16x64xf32>
    %c0_31 = arith.constant 0 : index
    %c0_32 = arith.constant 0 : index
    %c0_33 = arith.constant 0 : index
    %99 = vector.load %arg9[%c0_31, %c0_32, %c0_33] : memref<2x1x64xf32, #tpu.memory_space<vmem>>, vector<1x1x64xf32>
    %100 = vector.shape_cast %99 : vector<1x1x64xf32> to vector<1x64xf32>
    %c0_34 = arith.constant 0 : index
    %c0_35 = arith.constant 0 : index
    %c0_36 = arith.constant 0 : index
    %101 = vector.load %arg10[%c0_34, %c0_35, %c0_36] : memref<2x1x64xf32, #tpu.memory_space<vmem>>, vector<1x1x64xf32>
    %102 = vector.shape_cast %101 : vector<1x1x64xf32> to vector<1x64xf32>
    %cst_37 = arith.constant dense<0.000000e+00> : vector<16xf32>
    %103 = vector.multi_reduction <add>, %98, %cst_37 [1] : vector<16x64xf32> to vector<16xf32>
    %104 = vector.shape_cast %103 : vector<16xf32> to vector<16x1xf32>
    %cst_38 = arith.constant 6.400000e+01 : f32
    %105 = vector.broadcast %cst_38 : f32 to vector<16x1xf32>
    %106 = arith.divf %104, %105 : vector<16x1xf32>
    %107 = vector.broadcast %106 : vector<16x1xf32> to vector<16x64xf32>
    %108 = arith.subf %98, %107 : vector<16x64xf32>
    %109 = arith.mulf %108, %108 : vector<16x64xf32>
    %cst_39 = arith.constant dense<0.000000e+00> : vector<16xf32>
    %110 = vector.multi_reduction <add>, %109, %cst_39 [1] : vector<16x64xf32> to vector<16xf32>
    %111 = vector.shape_cast %110 : vector<16xf32> to vector<16x1xf32>
    %cst_40 = arith.constant 6.400000e+01 : f32
    %112 = vector.broadcast %cst_40 : f32 to vector<16x1xf32>
    %113 = arith.divf %111, %112 : vector<16x1xf32>
    %114 = vector.broadcast %106 : vector<16x1xf32> to vector<16x64xf32>
    %115 = arith.subf %98, %114 : vector<16x64xf32>
    %cst_41 = arith.constant 9.99999996E-13 : f32
    %116 = vector.broadcast %cst_41 : f32 to vector<16x1xf32>
    %117 = arith.addf %113, %116 : vector<16x1xf32>
    %118 = math.rsqrt %117 : vector<16x1xf32>
    %119 = vector.broadcast %118 : vector<16x1xf32> to vector<16x64xf32>
    %120 = arith.mulf %115, %119 : vector<16x64xf32>
    %121 = vector.broadcast %100 : vector<1x64xf32> to vector<16x64xf32>
    %122 = arith.mulf %120, %121 : vector<16x64xf32>
    %123 = vector.broadcast %102 : vector<1x64xf32> to vector<16x64xf32>
    %124 = arith.addf %122, %123 : vector<16x64xf32>
    %125 = arith.truncf %124 : vector<16x64xf32> to vector<16x64xbf16>
    %c0_42 = arith.constant 0 : index
    %c0_43 = arith.constant 0 : index
    %c0_44 = arith.constant 0 : index
    %126 = vector.load %arg11[%c0_42, %c0_43, %c0_44] : memref<2x64x128xbf16, #tpu.memory_space<vmem>>, vector<1x64x128xbf16>
    %127 = vector.shape_cast %126 : vector<1x64x128xbf16> to vector<64x128xbf16>
    %cst_45 = arith.constant dense<0.000000e+00> : vector<16x128xf32>
    %128 = tpu.matmul %125, %127, %cst_45 {dimension_numbers = #tpu.dot_dimension_numbers<[1], [0], [0], [1], [0, 0, 1, 1], [], []>} : vector<16x64xbf16>, vector<64x128xbf16>, vector<16x128xf32> -> vector<16x128xf32>
    %c0_46 = arith.constant 0 : index
    %c0_47 = arith.constant 0 : index
    %c0_48 = arith.constant 0 : index
    %129 = vector.load %arg12[%c0_46, %c0_47, %c0_48] : memref<2x1x128xf32, #tpu.memory_space<vmem>>, vector<1x1x128xf32>
    %130 = vector.shape_cast %129 : vector<1x1x128xf32> to vector<1x128xf32>
    %131 = vector.broadcast %130 : vector<1x128xf32> to vector<16x128xf32>
    %132 = arith.addf %128, %131 : vector<16x128xf32>
    %133 = arith.mulf %132, %132 : vector<16x128xf32>
    %134 = arith.mulf %132, %133 : vector<16x128xf32>
    %cst_49 = arith.constant 4.471500e-02 : f32
    %135 = vector.broadcast %cst_49 : f32 to vector<16x128xf32>
    %136 = arith.mulf %135, %134 : vector<16x128xf32>
    %137 = arith.addf %132, %136 : vector<16x128xf32>
    %cst_50 = arith.constant 0.797884583 : f32
    %138 = vector.broadcast %cst_50 : f32 to vector<16x128xf32>
    %139 = arith.mulf %138, %137 : vector<16x128xf32>
    %140 = math.tanh %139 : vector<16x128xf32>
    %cst_51 = arith.constant 1.000000e+00 : f32
    %141 = vector.broadcast %cst_51 : f32 to vector<16x128xf32>
    %142 = arith.addf %141, %140 : vector<16x128xf32>
    %cst_52 = arith.constant 5.000000e-01 : f32
    %143 = vector.broadcast %cst_52 : f32 to vector<16x128xf32>
    %144 = arith.mulf %143, %142 : vector<16x128xf32>
    %145 = arith.mulf %132, %144 : vector<16x128xf32>
    %146 = arith.truncf %145 : vector<16x128xf32> to vector<16x128xbf16>
    %c0_53 = arith.constant 0 : index
    %c0_54 = arith.constant 0 : index
    %c0_55 = arith.constant 0 : index
    %147 = vector.load %arg13[%c0_53, %c0_54, %c0_55] : memref<2x128x64xbf16, #tpu.memory_space<vmem>>, vector<1x128x64xbf16>
    %148 = vector.shape_cast %147 : vector<1x128x64xbf16> to vector<128x64xbf16>
    %cst_56 = arith.constant dense<0.000000e+00> : vector<16x64xf32>
    %149 = tpu.matmul %146, %148, %cst_56 {dimension_numbers = #tpu.dot_dimension_numbers<[1], [0], [0], [1], [0, 0, 1, 1], [], []>} : vector<16x128xbf16>, vector<128x64xbf16>, vector<16x64xf32> -> vector<16x64xf32>
    %c0_57 = arith.constant 0 : index
    %c0_58 = arith.constant 0 : index
    %c0_59 = arith.constant 0 : index
    %150 = vector.load %arg14[%c0_57, %c0_58, %c0_59] : memref<2x1x64xf32, #tpu.memory_space<vmem>>, vector<1x1x64xf32>
    %151 = vector.shape_cast %150 : vector<1x1x64xf32> to vector<1x64xf32>
    %152 = vector.broadcast %151 : vector<1x64xf32> to vector<16x64xf32>
    %153 = arith.addf %149, %152 : vector<16x64xf32>
    %154 = arith.addf %153, %124 : vector<16x64xf32>
    %c0_60 = arith.constant 0 : index
    %c0_61 = arith.constant 0 : index
    %c0_62 = arith.constant 0 : index
    %155 = vector.load %arg15[%c0_60, %c0_61, %c0_62] : memref<2x1x64xf32, #tpu.memory_space<vmem>>, vector<1x1x64xf32>
    %156 = vector.shape_cast %155 : vector<1x1x64xf32> to vector<1x64xf32>
    %c0_63 = arith.constant 0 : index
    %c0_64 = arith.constant 0 : index
    %c0_65 = arith.constant 0 : index
    %157 = vector.load %arg16[%c0_63, %c0_64, %c0_65] : memref<2x1x64xf32, #tpu.memory_space<vmem>>, vector<1x1x64xf32>
    %158 = vector.shape_cast %157 : vector<1x1x64xf32> to vector<1x64xf32>
    %cst_66 = arith.constant dense<0.000000e+00> : vector<16xf32>
    %159 = vector.multi_reduction <add>, %154, %cst_66 [1] : vector<16x64xf32> to vector<16xf32>
    %160 = vector.shape_cast %159 : vector<16xf32> to vector<16x1xf32>
    %cst_67 = arith.constant 6.400000e+01 : f32
    %161 = vector.broadcast %cst_67 : f32 to vector<16x1xf32>
    %162 = arith.divf %160, %161 : vector<16x1xf32>
    %163 = vector.broadcast %162 : vector<16x1xf32> to vector<16x64xf32>
    %164 = arith.subf %154, %163 : vector<16x64xf32>
    %165 = arith.mulf %164, %164 : vector<16x64xf32>
    %cst_68 = arith.constant dense<0.000000e+00> : vector<16xf32>
    %166 = vector.multi_reduction <add>, %165, %cst_68 [1] : vector<16x64xf32> to vector<16xf32>
    %167 = vector.shape_cast %166 : vector<16xf32> to vector<16x1xf32>
    %cst_69 = arith.constant 6.400000e+01 : f32
    %168 = vector.broadcast %cst_69 : f32 to vector<16x1xf32>
    %169 = arith.divf %167, %168 : vector<16x1xf32>
    %170 = vector.broadcast %162 : vector<16x1xf32> to vector<16x64xf32>
    %171 = arith.subf %154, %170 : vector<16x64xf32>
    %cst_70 = arith.constant 9.99999996E-13 : f32
    %172 = vector.broadcast %cst_70 : f32 to vector<16x1xf32>
    %173 = arith.addf %169, %172 : vector<16x1xf32>
    %174 = math.rsqrt %173 : vector<16x1xf32>
    %175 = vector.broadcast %174 : vector<16x1xf32> to vector<16x64xf32>
    %176 = arith.mulf %171, %175 : vector<16x64xf32>
    %177 = vector.broadcast %156 : vector<1x64xf32> to vector<16x64xf32>
    %178 = arith.mulf %176, %177 : vector<16x64xf32>
    %179 = vector.broadcast %158 : vector<1x64xf32> to vector<16x64xf32>
    %180 = arith.addf %178, %179 : vector<16x64xf32>
    %181 = arith.truncf %180 : vector<16x64xf32> to vector<16x64xbf16>
    %c1 = arith.constant 1 : index
    %c0_71 = arith.constant 0 : index
    %c0_72 = arith.constant 0 : index
    %182 = vector.load %arg5[%c1, %c0_71, %c0_72] : memref<2x64x192xbf16, #tpu.memory_space<vmem>>, vector<1x64x192xbf16>
    %183 = vector.shape_cast %182 : vector<1x64x192xbf16> to vector<64x192xbf16>
    %cst_73 = arith.constant dense<0.000000e+00> : vector<16x192xf32>
    %184 = tpu.matmul %181, %183, %cst_73 {dimension_numbers = #tpu.dot_dimension_numbers<[1], [0], [0], [1], [0, 0, 1, 1], [], []>} : vector<16x64xbf16>, vector<64x192xbf16>, vector<16x192xf32> -> vector<16x192xf32>
    %c1_74 = arith.constant 1 : index
    %c0_75 = arith.constant 0 : index
    %c0_76 = arith.constant 0 : index
    %185 = vector.load %arg6[%c1_74, %c0_75, %c0_76] : memref<2x1x192xf32, #tpu.memory_space<vmem>>, vector<1x1x192xf32>
    %186 = vector.shape_cast %185 : vector<1x1x192xf32> to vector<1x192xf32>
    %187 = vector.broadcast %186 : vector<1x192xf32> to vector<16x192xf32>
    %188 = arith.addf %184, %187 : vector<16x192xf32>
    %189 = arith.truncf %188 : vector<16x192xf32> to vector<16x192xbf16>
    %190 = vector.extract_strided_slice %189 {offsets = [0, 0], sizes = [16, 64], strides = [1, 1]} : vector<16x192xbf16> to vector<16x64xbf16>
    %191 = vector.extract_strided_slice %190 {offsets = [0, 0], sizes = [16, 16], strides = [1, 1]} : vector<16x64xbf16> to vector<16x16xbf16>
    %192 = vector.shape_cast %191 : vector<16x16xbf16> to vector<2x8x16xbf16>
    %193 = vector.extract_strided_slice %190 {offsets = [0, 16], sizes = [16, 16], strides = [1, 1]} : vector<16x64xbf16> to vector<16x16xbf16>
    %194 = vector.shape_cast %193 : vector<16x16xbf16> to vector<2x8x16xbf16>
    %195 = vector.extract_strided_slice %190 {offsets = [0, 32], sizes = [16, 16], strides = [1, 1]} : vector<16x64xbf16> to vector<16x16xbf16>
    %196 = vector.shape_cast %195 : vector<16x16xbf16> to vector<2x8x16xbf16>
    %197 = vector.extract_strided_slice %190 {offsets = [0, 48], sizes = [16, 16], strides = [1, 1]} : vector<16x64xbf16> to vector<16x16xbf16>
    %198 = vector.shape_cast %197 : vector<16x16xbf16> to vector<2x8x16xbf16>
    %199 = tpu.concatenate %192, %194, %196, %198 in 0 : vector<2x8x16xbf16>, vector<2x8x16xbf16>, vector<2x8x16xbf16>, vector<2x8x16xbf16> -> vector<8x8x16xbf16>
    %200 = vector.extract_strided_slice %189 {offsets = [0, 64], sizes = [16, 64], strides = [1, 1]} : vector<16x192xbf16> to vector<16x64xbf16>
    %201 = vector.extract_strided_slice %200 {offsets = [0, 0], sizes = [16, 16], strides = [1, 1]} : vector<16x64xbf16> to vector<16x16xbf16>
    %202 = vector.shape_cast %201 : vector<16x16xbf16> to vector<2x8x16xbf16>
    %203 = vector.extract_strided_slice %200 {offsets = [0, 16], sizes = [16, 16], strides = [1, 1]} : vector<16x64xbf16> to vector<16x16xbf16>
    %204 = vector.shape_cast %203 : vector<16x16xbf16> to vector<2x8x16xbf16>
    %205 = vector.extract_strided_slice %200 {offsets = [0, 32], sizes = [16, 16], strides = [1, 1]} : vector<16x64xbf16> to vector<16x16xbf16>
    %206 = vector.shape_cast %205 : vector<16x16xbf16> to vector<2x8x16xbf16>
    %207 = vector.extract_strided_slice %200 {offsets = [0, 48], sizes = [16, 16], strides = [1, 1]} : vector<16x64xbf16> to vector<16x16xbf16>
    %208 = vector.shape_cast %207 : vector<16x16xbf16> to vector<2x8x16xbf16>
    %209 = tpu.concatenate %202, %204, %206, %208 in 0 : vector<2x8x16xbf16>, vector<2x8x16xbf16>, vector<2x8x16xbf16>, vector<2x8x16xbf16> -> vector<8x8x16xbf16>
    %210 = vector.extract_strided_slice %189 {offsets = [0, 128], sizes = [16, 64], strides = [1, 1]} : vector<16x192xbf16> to vector<16x64xbf16>
    %211 = vector.extract_strided_slice %210 {offsets = [0, 0], sizes = [16, 16], strides = [1, 1]} : vector<16x64xbf16> to vector<16x16xbf16>
    %212 = vector.shape_cast %211 : vector<16x16xbf16> to vector<2x8x16xbf16>
    %213 = vector.extract_strided_slice %210 {offsets = [0, 16], sizes = [16, 16], strides = [1, 1]} : vector<16x64xbf16> to vector<16x16xbf16>
    %214 = vector.shape_cast %213 : vector<16x16xbf16> to vector<2x8x16xbf16>
    %215 = vector.extract_strided_slice %210 {offsets = [0, 32], sizes = [16, 16], strides = [1, 1]} : vector<16x64xbf16> to vector<16x16xbf16>
    %216 = vector.shape_cast %215 : vector<16x16xbf16> to vector<2x8x16xbf16>
    %217 = vector.extract_strided_slice %210 {offsets = [0, 48], sizes = [16, 16], strides = [1, 1]} : vector<16x64xbf16> to vector<16x16xbf16>
    %218 = vector.shape_cast %217 : vector<16x16xbf16> to vector<2x8x16xbf16>
    %219 = tpu.concatenate %212, %214, %216, %218 in 0 : vector<2x8x16xbf16>, vector<2x8x16xbf16>, vector<2x8x16xbf16>, vector<2x8x16xbf16> -> vector<8x8x16xbf16>
    "tpu.trace_start"() <{level = 10 : i32, message = "bqd,bkd->bqk"}> : () -> ()
    %cst_77 = arith.constant dense<0.000000e+00> : vector<8x8x8xf32>
    %220 = tpu.matmul %199, %209, %cst_77 {dimension_numbers = #tpu.dot_dimension_numbers<[2], [2], [1], [1], [0, 0, 0, 1, 1, 1], [0], [0]>} : vector<8x8x16xbf16>, vector<8x8x16xbf16>, vector<8x8x8xf32> -> vector<8x8x8xf32>
    "tpu.trace_stop"() : () -> ()
    %221 = vector.broadcast %25 : vector<8x1x8xf32> to vector<8x8x8xf32>
    %222 = arith.addf %220, %221 : vector<8x8x8xf32>
    %cst_78 = arith.constant dense<0xFF800000> : vector<8x8xf32>
    %223 = vector.multi_reduction <maximumf>, %222, %cst_78 [2] : vector<8x8x8xf32> to vector<8x8xf32>
    %cst_79 = arith.constant 0xFF800000 : f32
    %224 = vector.broadcast %cst_79 : f32 to vector<8x8xf32>
    %225 = arith.maximumf %224, %223 : vector<8x8xf32>
    %226 = vector.shape_cast %225 : vector<8x8xf32> to vector<8x8x1xf32>
    %227 = vector.broadcast %226 : vector<8x8x1xf32> to vector<8x8x8xf32>
    %228 = arith.subf %222, %227 : vector<8x8x8xf32>
    %229 = math.exp %228 : vector<8x8x8xf32>
    %cst_80 = arith.constant dense<0.000000e+00> : vector<8x8xf32>
    %230 = vector.multi_reduction <add>, %229, %cst_80 [2] : vector<8x8x8xf32> to vector<8x8xf32>
    %231 = vector.shape_cast %230 : vector<8x8xf32> to vector<8x8x1xf32>
    %232 = vector.broadcast %231 : vector<8x8x1xf32> to vector<8x8x8xf32>
    %233 = arith.divf %229, %232 : vector<8x8x8xf32>
    %234 = arith.truncf %233 : vector<8x8x8xf32> to vector<8x8x8xbf16>
    "tpu.trace_start"() <{level = 10 : i32, message = "bqk,bkd->bqd"}> : () -> ()
    %cst_81 = arith.constant dense<0.000000e+00> : vector<8x8x16xf32>
    %235 = tpu.matmul %234, %219, %cst_81 {dimension_numbers = #tpu.dot_dimension_numbers<[2], [1], [1], [2], [0, 0, 0, 1, 1, 2], [0], [0]>} : vector<8x8x8xbf16>, vector<8x8x16xbf16>, vector<8x8x16xf32> -> vector<8x8x16xf32>
    "tpu.trace_stop"() : () -> ()
    %236 = vector.extract_strided_slice %235 {offsets = [0, 0, 0], sizes = [2, 8, 16], strides = [1, 1, 1]} : vector<8x8x16xf32> to vector<2x8x16xf32>
    %237 = vector.shape_cast %236 : vector<2x8x16xf32> to vector<16x16xf32>
    %238 = vector.extract_strided_slice %235 {offsets = [2, 0, 0], sizes = [2, 8, 16], strides = [1, 1, 1]} : vector<8x8x16xf32> to vector<2x8x16xf32>
    %239 = vector.shape_cast %238 : vector<2x8x16xf32> to vector<16x16xf32>
    %240 = vector.extract_strided_slice %235 {offsets = [4, 0, 0], sizes = [2, 8, 16], strides = [1, 1, 1]} : vector<8x8x16xf32> to vector<2x8x16xf32>
    %241 = vector.shape_cast %240 : vector<2x8x16xf32> to vector<16x16xf32>
    %242 = vector.extract_strided_slice %235 {offsets = [6, 0, 0], sizes = [2, 8, 16], strides = [1, 1, 1]} : vector<8x8x16xf32> to vector<2x8x16xf32>
    %243 = vector.shape_cast %242 : vector<2x8x16xf32> to vector<16x16xf32>
    %244 = tpu.concatenate %237, %239, %241, %243 in 1 : vector<16x16xf32>, vector<16x16xf32>, vector<16x16xf32>, vector<16x16xf32> -> vector<16x64xf32>
    %245 = arith.truncf %244 : vector<16x64xf32> to vector<16x64xbf16>
    %c1_82 = arith.constant 1 : index
    %c0_83 = arith.constant 0 : index
    %c0_84 = arith.constant 0 : index
    %246 = vector.load %arg7[%c1_82, %c0_83, %c0_84] : memref<2x64x64xbf16, #tpu.memory_space<vmem>>, vector<1x64x64xbf16>
    %247 = vector.shape_cast %246 : vector<1x64x64xbf16> to vector<64x64xbf16>
    %cst_85 = arith.constant dense<0.000000e+00> : vector<16x64xf32>
    %248 = tpu.matmul %245, %247, %cst_85 {dimension_numbers = #tpu.dot_dimension_numbers<[1], [0], [0], [1], [0, 0, 1, 1], [], []>} : vector<16x64xbf16>, vector<64x64xbf16>, vector<16x64xf32> -> vector<16x64xf32>
    %c1_86 = arith.constant 1 : index
    %c0_87 = arith.constant 0 : index
    %c0_88 = arith.constant 0 : index
    %249 = vector.load %arg8[%c1_86, %c0_87, %c0_88] : memref<2x1x64xf32, #tpu.memory_space<vmem>>, vector<1x1x64xf32>
    %250 = vector.shape_cast %249 : vector<1x1x64xf32> to vector<1x64xf32>
    %251 = vector.broadcast %250 : vector<1x64xf32> to vector<16x64xf32>
    %252 = arith.addf %248, %251 : vector<16x64xf32>
    %253 = arith.addf %252, %180 : vector<16x64xf32>
    %c1_89 = arith.constant 1 : index
    %c0_90 = arith.constant 0 : index
    %c0_91 = arith.constant 0 : index
    %254 = vector.load %arg9[%c1_89, %c0_90, %c0_91] : memref<2x1x64xf32, #tpu.memory_space<vmem>>, vector<1x1x64xf32>
    %255 = vector.shape_cast %254 : vector<1x1x64xf32> to vector<1x64xf32>
    %c1_92 = arith.constant 1 : index
    %c0_93 = arith.constant 0 : index
    %c0_94 = arith.constant 0 : index
    %256 = vector.load %arg10[%c1_92, %c0_93, %c0_94] : memref<2x1x64xf32, #tpu.memory_space<vmem>>, vector<1x1x64xf32>
    %257 = vector.shape_cast %256 : vector<1x1x64xf32> to vector<1x64xf32>
    %cst_95 = arith.constant dense<0.000000e+00> : vector<16xf32>
    %258 = vector.multi_reduction <add>, %253, %cst_95 [1] : vector<16x64xf32> to vector<16xf32>
    %259 = vector.shape_cast %258 : vector<16xf32> to vector<16x1xf32>
    %cst_96 = arith.constant 6.400000e+01 : f32
    %260 = vector.broadcast %cst_96 : f32 to vector<16x1xf32>
    %261 = arith.divf %259, %260 : vector<16x1xf32>
    %262 = vector.broadcast %261 : vector<16x1xf32> to vector<16x64xf32>
    %263 = arith.subf %253, %262 : vector<16x64xf32>
    %264 = arith.mulf %263, %263 : vector<16x64xf32>
    %cst_97 = arith.constant dense<0.000000e+00> : vector<16xf32>
    %265 = vector.multi_reduction <add>, %264, %cst_97 [1] : vector<16x64xf32> to vector<16xf32>
    %266 = vector.shape_cast %265 : vector<16xf32> to vector<16x1xf32>
    %cst_98 = arith.constant 6.400000e+01 : f32
    %267 = vector.broadcast %cst_98 : f32 to vector<16x1xf32>
    %268 = arith.divf %266, %267 : vector<16x1xf32>
    %269 = vector.broadcast %261 : vector<16x1xf32> to vector<16x64xf32>
    %270 = arith.subf %253, %269 : vector<16x64xf32>
    %cst_99 = arith.constant 9.99999996E-13 : f32
    %271 = vector.broadcast %cst_99 : f32 to vector<16x1xf32>
    %272 = arith.addf %268, %271 : vector<16x1xf32>
    %273 = math.rsqrt %272 : vector<16x1xf32>
    %274 = vector.broadcast %273 : vector<16x1xf32> to vector<16x64xf32>
    %275 = arith.mulf %270, %274 : vector<16x64xf32>
    %276 = vector.broadcast %255 : vector<1x64xf32> to vector<16x64xf32>
    %277 = arith.mulf %275, %276 : vector<16x64xf32>
    %278 = vector.broadcast %257 : vector<1x64xf32> to vector<16x64xf32>
    %279 = arith.addf %277, %278 : vector<16x64xf32>
    %280 = arith.truncf %279 : vector<16x64xf32> to vector<16x64xbf16>
    %c1_100 = arith.constant 1 : index
    %c0_101 = arith.constant 0 : index
    %c0_102 = arith.constant 0 : index
    %281 = vector.load %arg11[%c1_100, %c0_101, %c0_102] : memref<2x64x128xbf16, #tpu.memory_space<vmem>>, vector<1x64x128xbf16>
    %282 = vector.shape_cast %281 : vector<1x64x128xbf16> to vector<64x128xbf16>
    %cst_103 = arith.constant dense<0.000000e+00> : vector<16x128xf32>
    %283 = tpu.matmul %280, %282, %cst_103 {dimension_numbers = #tpu.dot_dimension_numbers<[1], [0], [0], [1], [0, 0, 1, 1], [], []>} : vector<16x64xbf16>, vector<64x128xbf16>, vector<16x128xf32> -> vector<16x128xf32>
    %c1_104 = arith.constant 1 : index
    %c0_105 = arith.constant 0 : index
    %c0_106 = arith.constant 0 : index
    %284 = vector.load %arg12[%c1_104, %c0_105, %c0_106] : memref<2x1x128xf32, #tpu.memory_space<vmem>>, vector<1x1x128xf32>
    %285 = vector.shape_cast %284 : vector<1x1x128xf32> to vector<1x128xf32>
    %286 = vector.broadcast %285 : vector<1x128xf32> to vector<16x128xf32>
    %287 = arith.addf %283, %286 : vector<16x128xf32>
    %288 = arith.mulf %287, %287 : vector<16x128xf32>
    %289 = arith.mulf %287, %288 : vector<16x128xf32>
    %cst_107 = arith.constant 4.471500e-02 : f32
    %290 = vector.broadcast %cst_107 : f32 to vector<16x128xf32>
    %291 = arith.mulf %290, %289 : vector<16x128xf32>
    %292 = arith.addf %287, %291 : vector<16x128xf32>
    %cst_108 = arith.constant 0.797884583 : f32
    %293 = vector.broadcast %cst_108 : f32 to vector<16x128xf32>
    %294 = arith.mulf %293, %292 : vector<16x128xf32>
    %295 = math.tanh %294 : vector<16x128xf32>
    %cst_109 = arith.constant 1.000000e+00 : f32
    %296 = vector.broadcast %cst_109 : f32 to vector<16x128xf32>
    %297 = arith.addf %296, %295 : vector<16x128xf32>
    %cst_110 = arith.constant 5.000000e-01 : f32
    %298 = vector.broadcast %cst_110 : f32 to vector<16x128xf32>
    %299 = arith.mulf %298, %297 : vector<16x128xf32>
    %300 = arith.mulf %287, %299 : vector<16x128xf32>
    %301 = arith.truncf %300 : vector<16x128xf32> to vector<16x128xbf16>
    %c1_111 = arith.constant 1 : index
    %c0_112 = arith.constant 0 : index
    %c0_113 = arith.constant 0 : index
    %302 = vector.load %arg13[%c1_111, %c0_112, %c0_113] : memref<2x128x64xbf16, #tpu.memory_space<vmem>>, vector<1x128x64xbf16>
    %303 = vector.shape_cast %302 : vector<1x128x64xbf16> to vector<128x64xbf16>
    %cst_114 = arith.constant dense<0.000000e+00> : vector<16x64xf32>
    %304 = tpu.matmul %301, %303, %cst_114 {dimension_numbers = #tpu.dot_dimension_numbers<[1], [0], [0], [1], [0, 0, 1, 1], [], []>} : vector<16x128xbf16>, vector<128x64xbf16>, vector<16x64xf32> -> vector<16x64xf32>
    %c1_115 = arith.constant 1 : index
    %c0_116 = arith.constant 0 : index
    %c0_117 = arith.constant 0 : index
    %305 = vector.load %arg14[%c1_115, %c0_116, %c0_117] : memref<2x1x64xf32, #tpu.memory_space<vmem>>, vector<1x1x64xf32>
    %306 = vector.shape_cast %305 : vector<1x1x64xf32> to vector<1x64xf32>
    %307 = vector.broadcast %306 : vector<1x64xf32> to vector<16x64xf32>
    %308 = arith.addf %304, %307 : vector<16x64xf32>
    %309 = arith.addf %308, %279 : vector<16x64xf32>
    %c1_118 = arith.constant 1 : index
    %c0_119 = arith.constant 0 : index
    %c0_120 = arith.constant 0 : index
    %310 = vector.load %arg15[%c1_118, %c0_119, %c0_120] : memref<2x1x64xf32, #tpu.memory_space<vmem>>, vector<1x1x64xf32>
    %311 = vector.shape_cast %310 : vector<1x1x64xf32> to vector<1x64xf32>
    %c1_121 = arith.constant 1 : index
    %c0_122 = arith.constant 0 : index
    %c0_123 = arith.constant 0 : index
    %312 = vector.load %arg16[%c1_121, %c0_122, %c0_123] : memref<2x1x64xf32, #tpu.memory_space<vmem>>, vector<1x1x64xf32>
    %313 = vector.shape_cast %312 : vector<1x1x64xf32> to vector<1x64xf32>
    %cst_124 = arith.constant dense<0.000000e+00> : vector<16xf32>
    %314 = vector.multi_reduction <add>, %309, %cst_124 [1] : vector<16x64xf32> to vector<16xf32>
    %315 = vector.shape_cast %314 : vector<16xf32> to vector<16x1xf32>
    %cst_125 = arith.constant 6.400000e+01 : f32
    %316 = vector.broadcast %cst_125 : f32 to vector<16x1xf32>
    %317 = arith.divf %315, %316 : vector<16x1xf32>
    %318 = vector.broadcast %317 : vector<16x1xf32> to vector<16x64xf32>
    %319 = arith.subf %309, %318 : vector<16x64xf32>
    %320 = arith.mulf %319, %319 : vector<16x64xf32>
    %cst_126 = arith.constant dense<0.000000e+00> : vector<16xf32>
    %321 = vector.multi_reduction <add>, %320, %cst_126 [1] : vector<16x64xf32> to vector<16xf32>
    %322 = vector.shape_cast %321 : vector<16xf32> to vector<16x1xf32>
    %cst_127 = arith.constant 6.400000e+01 : f32
    %323 = vector.broadcast %cst_127 : f32 to vector<16x1xf32>
    %324 = arith.divf %322, %323 : vector<16x1xf32>
    %325 = vector.broadcast %317 : vector<16x1xf32> to vector<16x64xf32>
    %326 = arith.subf %309, %325 : vector<16x64xf32>
    %cst_128 = arith.constant 9.99999996E-13 : f32
    %327 = vector.broadcast %cst_128 : f32 to vector<16x1xf32>
    %328 = arith.addf %324, %327 : vector<16x1xf32>
    %329 = math.rsqrt %328 : vector<16x1xf32>
    %330 = vector.broadcast %329 : vector<16x1xf32> to vector<16x64xf32>
    %331 = arith.mulf %326, %330 : vector<16x64xf32>
    %332 = vector.broadcast %311 : vector<1x64xf32> to vector<16x64xf32>
    %333 = arith.mulf %331, %332 : vector<16x64xf32>
    %334 = vector.broadcast %313 : vector<1x64xf32> to vector<16x64xf32>
    %335 = arith.addf %333, %334 : vector<16x64xf32>
    %336 = vector.shape_cast %335 : vector<16x64xf32> to vector<2x8x64xf32>
    %337 = vector.extract_strided_slice %336 {offsets = [0, 0, 0], sizes = [2, 1, 64], strides = [1, 1, 1]} : vector<2x8x64xf32> to vector<2x1x64xf32>
    %338 = vector.shape_cast %337 : vector<2x1x64xf32> to vector<2x64xf32>
    %c0_129 = arith.constant 0 : index
    %c0_130 = arith.constant 0 : index
    %339 = vector.load %arg17[%c0_129, %c0_130] : memref<2x64xf32, #tpu.memory_space<vmem>>, vector<2x64xf32>
    tpu.vector_store %arg17[%c0_129, %c0_130], %338 {strides = array<i32>} : memref<2x64xf32, #tpu.memory_space<vmem>>, vector<2x64xf32>,
    return
  }
  func.func @transform_0(%arg0: i32) -> (i32, i32) {
    %c0_i32 = arith.constant 0 : i32
    %c0_i32_0 = arith.constant 0 : i32
    %c0_i32_1 = arith.constant 0 : i32
    return %c0_i32, %c0_i32_0 : i32, i32
  }
  func.func @transform_1(%arg0: i32) -> (i32, i32, i32) {
    %c0_i32 = arith.constant 0 : i32
    %c0_i32_0 = arith.constant 0 : i32
    %c0_i32_1 = arith.constant 0 : i32
    %c0_i32_2 = arith.constant 0 : i32
    return %c0_i32, %c0_i32_0, %c0_i32_1 : i32, i32, i32
  }
  func.func @transform_2(%arg0: i32) -> (i32, i32) {
    %c0_i32 = arith.constant 0 : i32
    %c0_i32_0 = arith.constant 0 : i32
    %c0_i32_1 = arith.constant 0 : i32
    return %c0_i32, %c0_i32_0 : i32, i32
  }
  func.func @transform_3(%arg0: i32) -> (i32, i32) {
    %c0_i32 = arith.constant 0 : i32
    %c0_i32_0 = arith.constant 0 : i32
    %c0_i32_1 = arith.constant 0 : i32
    return %c0_i32, %c0_i32_0 : i32, i32
  }
  func.func @transform_4(%arg0: i32) -> (i32, i32, i32) {
    %c0_i32 = arith.constant 0 : i32
    %c0_i32_0 = arith.constant 0 : i32
    %c0_i32_1 = arith.constant 0 : i32
    %c0_i32_2 = arith.constant 0 : i32
    return %c0_i32, %c0_i32_0, %c0_i32_1 : i32, i32, i32
  }
  func.func @transform_5(%arg0: i32) -> (i32, i32, i32) {
    %c0_i32 = arith.constant 0 : i32
    %c0_i32_0 = arith.constant 0 : i32
    %c0_i32_1 = arith.constant 0 : i32
    %c0_i32_2 = arith.constant 0 : i32
    return %c0_i32, %c0_i32_0, %c0_i32_1 : i32, i32, i32
  }
  func.func @transform_6(%arg0: i32) -> (i32, i32, i32) {
    %c0_i32 = arith.constant 0 : i32
    %c0_i32_0 = arith.constant 0 : i32
    %c0_i32_1 = arith.constant 0 : i32
    %c0_i32_2 = arith.constant 0 : i32
    return %c0_i32, %c0_i32_0, %c0_i32_1 : i32, i32, i32
  }
  func.func @transform_7(%arg0: i32) -> (i32, i32, i32) {
    %c0_i32 = arith.constant 0 : i32
    %c0_i32_0 = arith.constant 0 : i32
    %c0_i32_1 = arith.constant 0 : i32
    %c0_i32_2 = arith.constant 0 : i32
    return %c0_i32, %c0_i32_0, %c0_i32_1 : i32, i32, i32
  }
  func.func @transform_8(%arg0: i32) -> (i32, i32, i32) {
    %c0_i32 = arith.constant 0 : i32
    %c0_i32_0 = arith.constant 0 : i32
    %c0_i32_1 = arith.constant 0 : i32
    %c0_i32_2 = arith.constant 0 : i32
    return %c0_i32, %c0_i32_0, %c0_i32_1 : i32, i32, i32
  }
  func.func @transform_9(%arg0: i32) -> (i32, i32, i32) {
    %c0_i32 = arith.constant 0 : i32
    %c0_i32_0 = arith.constant 0 : i32
    %c0_i32_1 = arith.constant 0 : i32
    %c0_i32_2 = arith.constant 0 : i32
    return %c0_i32, %c0_i32_0, %c0_i32_1 : i32, i32, i32
  }
  func.func @transform_10(%arg0: i32) -> (i32, i32, i32) {
    %c0_i32 = arith.constant 0 : i32
    %c0_i32_0 = arith.constant 0 : i32
    %c0_i32_1 = arith.constant 0 : i32
    %c0_i32_2 = arith.constant 0 : i32
    return %c0_i32, %c0_i32_0, %c0_i32_1 : i32, i32, i32
  }
  func.func @transform_11(%arg0: i32) -> (i32, i32, i32) {
    %c0_i32 = arith.constant 0 : i32
    %c0_i32_0 = arith.constant 0 : i32
    %c0_i32_1 = arith.constant 0 : i32
    %c0_i32_2 = arith.constant 0 : i32
    return %c0_i32, %c0_i32_0, %c0_i32_1 : i32, i32, i32
  }
  func.func @transform_12(%arg0: i32) -> (i32, i32, i32) {
    %c0_i32 = arith.constant 0 : i32
    %c0_i32_0 = arith.constant 0 : i32
    %c0_i32_1 = arith.constant 0 : i32
    %c0_i32_2 = arith.constant 0 : i32
    return %c0_i32, %c0_i32_0, %c0_i32_1 : i32, i32, i32
  }
  func.func @transform_13(%arg0: i32) -> (i32, i32, i32) {
    %c0_i32 = arith.constant 0 : i32
    %c0_i32_0 = arith.constant 0 : i32
    %c0_i32_1 = arith.constant 0 : i32
    %c0_i32_2 = arith.constant 0 : i32
    return %c0_i32, %c0_i32_0, %c0_i32_1 : i32, i32, i32
  }
  func.func @transform_14(%arg0: i32) -> (i32, i32, i32) {
    %c0_i32 = arith.constant 0 : i32
    %c0_i32_0 = arith.constant 0 : i32
    %c0_i32_1 = arith.constant 0 : i32
    %c0_i32_2 = arith.constant 0 : i32
    return %c0_i32, %c0_i32_0, %c0_i32_1 : i32, i32, i32
  }
  func.func @transform_15(%arg0: i32) -> (i32, i32, i32) {
    %c0_i32 = arith.constant 0 : i32
    %c0_i32_0 = arith.constant 0 : i32
    %c0_i32_1 = arith.constant 0 : i32
    %c0_i32_2 = arith.constant 0 : i32
    return %c0_i32, %c0_i32_0, %c0_i32_1 : i32, i32, i32
  }
  func.func @transform_16(%arg0: i32) -> (i32, i32) {
    %c0_i32 = arith.constant 0 : i32
    %c0_i32_0 = arith.constant 0 : i32
    %c0_i32_1 = arith.constant 0 : i32
    return %c0_i32, %c0_i32_0 : i32, i32
  }
}

</mosaic_0001>

<bundles_post_ra>
// kernel: tpu_custom_call.1
= control target key start
LH: loop header
LB: loop body
LE: loop exit
PB: predicated region body
PF: predicated region fallthrough
CT: control target
= control target key end

     0   :  { %s3692_s0 = inlined_call_operand.hbm [shape: f32[16,64], index: 0, kind: input, shape index: {}]   ;;  %s3693_s1 = inlined_call_operand.hbm [shape: f32[8,1,8], index: 1, kind: input, shape index: {}]   ;;  %s3694_s2 = inlined_call_operand.hbm [shape: f32[1,64], index: 2, kind: input, shape index: {}]   ;;  %s3695_s3 = inlined_call_operand.hbm [shape: f32[1,64], index: 3, kind: input, shape index: {}]   ;;  %s3696_s4 = inlined_call_operand.vmem [shape: bf16[2,64,192], index: 4, kind: input, shape index: {}]   ;;  %s3697_s5 = inlined_call_operand.hbm [shape: f32[2,1,192], index: 5, kind: input, shape index: {}]   ;;  %s3698_s6 = inlined_call_operand.vmem [shape: bf16[2,64,64], index: 6, kind: input, shape index: {}]   ;;  %s3699_s7 = inlined_call_operand.vmem [shape: f32[2,1,64], index: 7, kind: input, shape index: {}]   ;;  %s3700_s8 = inlined_call_operand.vmem [shape: f32[2,1,64], index: 8, kind: input, shape index: {}]   ;;  %s3701_s9 = inlined_call_operand.vmem [shape: f32[2,1,64], index: 9, kind: input, shape index: {}]   ;;  %s3702_s10 = inlined_call_operand.hbm [shape: bf16[2,64,128], index: 10, kind: input, shape index: {}]   ;;  %s3703_s11 = inlined_call_operand.vmem [shape: f32[2,1,128], index: 11, kind: input, shape index: {}]   ;;  %s3704_s12 = inlined_call_operand.vmem [shape: bf16[2,128,64], index: 12, kind: input, shape index: {}]   ;;  %s3705_s13 = inlined_call_operand.vmem [shape: f32[2,1,64], index: 13, kind: input, shape index: {}]   ;;  %s3706_s14 = inlined_call_operand.hbm [shape: f32[2,1,64], index: 14, kind: input, shape index: {}]   ;;  %s3707_s15 = inlined_call_operand.vmem [shape: f32[2,1,64], index: 15, kind: input, shape index: {}]   ;;  %s3708_s16 = inlined_call_operand.hbm [shape: f32[2,64], index: 16, kind: output, shape index: {}]  }
   0x1   :  { %3709 = sst [smem:[#allocation20_spill]] %s3692_s0 }
   0x2   :  { %3710 = sst [smem:[#allocation21_spill]] %s3708_s16 }
   0x3   :  { %21 = vsyncpa [#allocation3], 0 }
   0x4   :  { %22 = vsyncpa [#allocation6], 0 }
   0x5   :  { %23 = vsyncpa [#allocation9], 0 }
   0x6   :  { %24 = vsyncpa [#allocation12], 0  ;;  %s43_s23 = sshll.u32 %s3693_s1, 4  ;;  %s44_s23 = int_to_ptr.hbm [resolvable:$true] %s43_s23 }
   0x7   :  { %25 = vsyncpa [#allocation4], 0  ;;  %s3002_s24 = smov [#allocation5]   ;;  %s68_s28 = sshll.u32 %s3695_s3, 4  ;;  %s69_s28 = int_to_ptr.hbm [resolvable:$true] %s68_s28 }
   0x8   :  { %s45_s25 = sshll.u32 %s3002_s24, 4  ;;  %s3003_s29 = smov 16   ;;  %s46_s25 = int_to_ptr.vmem [resolvable:$true] %s45_s25 }
   0x9   :  { %s3004_s30 = smov 1   ;;  %s3005_s0 = smov [#allocation8]  }
   0xa   :  { %51 = dma.hbm_to_vmem [thread:$0]  %s44_s23, 128, %s46_s25, [#allocation6], %s3003_s29, %s3003_s29, %s3004_s30  }
   0xb   :  { %s70_s17 = sshll.u32 %s3005_s0, 4  ;;  %s101_s19 = sshll.u32 %s3702_s10, 4  ;;  %s71_s17 = int_to_ptr.vmem [resolvable:$true] %s70_s17  ;;  %s102_s19 = int_to_ptr.hbm [resolvable:$true] %s101_s19 }
   0xc   :  { %73 = dma.hbm_to_vmem [thread:$0]  %s69_s28, 16, %s71_s17, [#allocation9]  }
   0xd   :  { %s3006_s20 = smov [#allocation11]   ;;  %s3711_s24 = sld [smem:[#allocation20_spill]] }
   0xe   :  { %s103_s21 = sshll.u32 %s3006_s20, 4  ;;  %s3007_s27 = smov 64   ;;  %s104_s21 = int_to_ptr.vmem [resolvable:$true] %s103_s21 }
   0xf   :  { %s3008_s16 = smov 4   ;;  %s3009_s23 = smov [#allocation2]  }
  0x10   :  { %109 = dma.hbm_to_vmem [thread:$0]  %s102_s19, 1024, %s104_s21, [#allocation12], %s3007_s27, %s3007_s27, %s3008_s16  }
  0x11   :  { %s32_s25 = sshll.u32 %s3009_s23, 4  ;;  %s3010_s10 = smov 128   ;;  %s33_s25 = int_to_ptr.vmem [resolvable:$true] %s32_s25 }
  0x12   :  { %s3011_s0 = smov 8   ;;  %s57_s18 = sshll.u32 %s3694_s2, 4  ;;  %s58_s18 = int_to_ptr.hbm [resolvable:$true] %s57_s18 }
  0x13   :  { %s30_s26 = sshll.u32 %s3711_s24, 4  ;;  %s3012_s1 = smov [#allocation7]   ;;  %s31_s26 = int_to_ptr.hbm [resolvable:$true] %s30_s26 }
  0x14   :  { %38 = dma.hbm_to_vmem [thread:$0]  %s31_s26, 256, %s33_s25, [#allocation3], %s3010_s10, %s3010_s10, %s3011_s0  }
  0x15   :  { %s59_s20 = sshll.u32 %s3012_s1, 4  ;;  %s80_s24 = sshll.u32 %s3697_s5, 4  ;;  %s60_s20 = int_to_ptr.vmem [resolvable:$true] %s59_s20  ;;  %s81_s24 = int_to_ptr.hbm [resolvable:$true] %s80_s24 }
  0x16   :  { %62 = dma.hbm_to_vmem [thread:$0]  %s58_s18, 16, %s60_s20, [#allocation6]  }
  0x17   :  { %s3013_s16 = smov [#allocation10]   ;;  %s3014_s21 = smov 32  }
  0x18   :  { %s82_s19 = sshll.u32 %s3013_s16, 4  ;;  %s3015_s23 = smov 2   ;;  %s83_s19 = int_to_ptr.vmem [resolvable:$true] %s82_s19 }
  0x19   :  { %88 = dma.hbm_to_vmem [thread:$0]  %s81_s24, 64, %s83_s19, [#allocation9], %s3014_s21, %s3014_s21, %s3015_s23  }
  0x1a   :  { %s120_s25 = sshll.u32 %s3706_s14, 4  ;;  %s3016_s10 = smov [#allocation13]   ;;  %s121_s25 = int_to_ptr.hbm [resolvable:$true] %s120_s25 }
  0x1b   :  { %s122_s0 = sshll.u32 %s3016_s10, 4  ;;  %s123_s0 = int_to_ptr.vmem [resolvable:$true] %s122_s0 }
  0x1c   :  { %128 = dma.hbm_to_vmem [thread:$0]  %s121_s25, 32, %s123_s0, [#allocation12], %s3003_s29, %s3003_s29, %s3004_s30  }
  0x1d   :  { %2992 = dma.done.wait [#allocation3], 256  }
  0x1e   :  { %2993 = vsyncadd [#allocation3], 4294967040 }
  0x1f   :  { %2994 = dma.done.wait [#allocation6], 144  }
  0x20   :  { %2995 = vsyncadd [#allocation6], 4294967152 }
  0x21   :  { %2996 = dma.done.wait [#allocation9], 80  }
  0x22   :  { %2997 = vsyncadd [#allocation9], 4294967216 }
  0x23   :  { %2998 = dma.done.wait [#allocation12], 1056  }
  0x24   :  { %2999 = vsyncadd [#allocation12], 4294966240  ;;  %vm164_vm0 = vcmask 523264   ;;  %v160_v0 = vld [vmem:[#allocation2] sm:$0xff]  ;;  %v161_v1 = vld [vmem:[#allocation2 + $0x8] sm:$0xff]  ;;  %v3017_v4 = vmov 64.0  }
  0x25   :  { %v165_v2 = vsel %vm164_vm0, %v160_v0, 0.0  ;;  %v168_v3 = vsel %vm164_vm0, %v161_v1, 0.0  ;;  %2698 = vrcp.f32 %v3017_v4  ;;  %v2331_v21 = vld [vmem:[%s3696_s4 + $0x30] sm:$0xf]  ;;  %v2582_v22 = vld [vmem:[%s3696_s4 + $0x34] sm:$0xf0] }
  0x26   :  { %166 = vadd.xlane.f32.xlu0 %v165_v2  ;;  %v2332_v23 = vor.u32 %v2582_v22, %v2331_v21  ;;  %v2323_v24 = vld [vmem:[%s3696_s4 + $0x20] sm:$0xf]  ;;  %v2580_v25 = vld [vmem:[%s3696_s4 + $0x24] sm:$0xf0]  ;;  %v2315_v27 = vld [vmem:[%s3696_s4 + $0x10] sm:$0xf] }
  0x27   :  { %v2324_v26 = vor.u32 %v2580_v25, %v2323_v24  ;;  %v2578_v28 = vld [vmem:[%s3696_s4 + $0x14] sm:$0xf0]  ;;  %v2307_v30 = vld [vmem:[%s3696_s4] sm:$0xf]  ;;  %v2576_v31 = vld [vmem:[%s3696_s4 + $0x4] sm:$0xf0] }
  0x28   :  { %296 = vmatpush.bf16.msra.mxu1 %v2332_v23  ;;  %v2316_v29 = vor.u32 %v2578_v28, %v2315_v27  ;;  %v2308_v33 = vor.u32 %v2576_v31, %v2307_v30  ;;  %v2581_v36 = vld [vmem:[%s3696_s4 + $0x34] sm:$0xf]  ;;  %v2333_v37 = vld [vmem:[%s3696_s4 + $0x38] sm:$0xf0]  ;;  %v2579_v39 = vld [vmem:[%s3696_s4 + $0x24] sm:$0xf] }
  0x29   :  { %v2336_v38 = vor.u32 %v2581_v36, %v2333_v37  ;;  %v2325_v40 = vld [vmem:[%s3696_s4 + $0x28] sm:$0xf0]  ;;  %v2577_v44 = vld [vmem:[%s3696_s4 + $0x14] sm:$0xf]  ;;  %v2317_v45 = vld [vmem:[%s3696_s4 + $0x18] sm:$0xf0] }
  0x2a   :  { %v2328_v42 = vor.u32 %v2579_v39, %v2325_v40  ;;  %v2320_v49 = vor.u32 %v2577_v44, %v2317_v45  ;;  %v2575_v50 = vld [vmem:[%s3696_s4 + $0x4] sm:$0xf]  ;;  %v2309_v51 = vld [vmem:[%s3696_s4 + $0x8] sm:$0xf0]  ;;  %s3018_s23 = smov 80   ;;  %s3019_s26 = smov 112  }
  0x2b   :  { %v2699_v5 = vpop.eup %2698  ;;  %v2312_v54 = vor.u32 %v2575_v50, %v2309_v51  ;;  %s3020_s2 = smov 96   ;;  %vm372_vm8 = vcmask 130048   ;;  %vm757_vm9 = vcmask 1043456   ;;  %vm553_vm10 = vcmask 64512   ;;  %s3021_s25 = smov 48  }
  0x2c   :  { %v172_v6 = vmul.f32 64.0, %v2699_v5  ;;  %vm176_vm1 = vweird.f32 %v2699_v5  ;;  %297 = vmatpush.bf16.msra.mxu1 %v2324_v26 }
  0x2e   :  { %169 = vadd.xlane.f32.xlu0 %v168_v3  ;;  %v173_v7 = vsub.f32 1.0, %v172_v6 }
  0x30   :  { %v174_v8 = vmul.f32 %v2699_v5, %v173_v7  ;;  %298 = vmatpush.bf16.msra.mxu1 %v2316_v29 }
  0x32   :  { %v175_v9 = vadd.f32 %v2699_v5, %v174_v8 }
  0x34   :  { %v3141_v10 = vsel %vm176_vm1, %v2699_v5, %v175_v9  ;;  %299 = vmatpush.bf16.msra.mxu1 %v2308_v33  ;;  %v2675_v5 = vld [vmem:[#allocation8] ss:$0 sm:$0xff] }
  0x38   :  { %310 = vmatpush.bf16.msrb.mxu1 %v2336_v38 }
  0x3c   :  { %311 = vmatpush.bf16.msrb.mxu1 %v2328_v42 }
  0x40   :  { %312 = vmatpush.bf16.msrb.mxu1 %v2320_v49 }
  0x44   :  { %313 = vmatpush.bf16.msrb.mxu1 %v2312_v54 }
  0x99   :  { %v167_v11 = vpop.xlane.xlu0 %166 }
  0x9a   :  { %v178_v12 = vmul.f32 %v3141_v10, %v167_v11 }
  0x9c   :  { %v3144_v13 = vsub.f32 %v160_v0, %v178_v12  ;;  %v2674_v0 = vld [vmem:[#allocation7] ss:$0 sm:$0xff] }
  0x9e   :  { %v182_v14 = vmul.f32 %v3144_v13, %v3144_v13 }
  0xa0   :  { %v184_v15 = vsel %vm164_vm0, %v182_v14, 0.0 }
  0xa1   :  { %185 = vadd.xlane.f32.xlu1 %v184_v15  ;;  %v170_v16 = vpop.xlane.xlu0 %169 }
  0xa2   :  { %v179_v17 = vmul.f32 %v3141_v10, %v170_v16 }
  0xa4   :  { %v3150_v18 = vsub.f32 %v161_v1, %v179_v17 }
  0xa6   :  { %v183_v19 = vmul.f32 %v3150_v18, %v3150_v18 }
  0xa8   :  { %v187_v20 = vsel %vm164_vm0, %v183_v19, 0.0 }
  0xa9   :  { %188 = vadd.xlane.f32.xlu1 %v187_v20 }
 0x114   :  { %v186_v32 = vpop.xlane.xlu1 %185 }
 0x115   :  { %v190_v34 = vmul.f32 %v186_v32, %v3141_v10 }
 0x117   :  { %v192_v35 = vadd.f32 1e-12, %v190_v34 }
 0x119   :  { %2700 = vrsqrt.f32 %v192_v35  ;;  %vm200_vm3 = vweird.f32 %v192_v35 }
 0x11c   :  { %v189_v41 = vpop.xlane.xlu1 %188 }
 0x11d   :  { %v191_v43 = vmul.f32 %v189_v41, %v3141_v10 }
 0x11f   :  { %v2701_v46 = vpop.eup %2700  ;;  %v193_v47 = vadd.f32 1e-12, %v191_v43 }
 0x120   :  { %v195_v48 = vmul.f32 %v2701_v46, %v192_v35  ;;  %vm201_vm2 = vweird.f32 %v2701_v46 }
 0x121   :  { %2702 = vrsqrt.f32 %v193_v47  ;;  %vm202_vm4 = vmor %vm200_vm3, %vm201_vm2  ;;  %vm210_vm6 = vweird.f32 %v193_v47 }
 0x122   :  { %v196_v52 = vmul.f32 %v2701_v46, %v195_v48 }
 0x124   :  { %v197_v53 = vmul.f32 0.5, %v196_v52 }
 0x126   :  { %v198_v55 = vsub.f32 1.5, %v197_v53 }
 0x127   :  { %v2703_v56 = vpop.eup %2702 }
 0x128   :  { %v199_v57 = vmul.f32 %v2701_v46, %v198_v55  ;;  %v205_v58 = vmul.f32 %v2703_v56, %v193_v47  ;;  %vm211_vm5 = vweird.f32 %v2703_v56 }
 0x129   :  { %vm212_vm7 = vmor %vm210_vm6, %vm211_vm5 }
 0x12a   :  { %v206_v59 = vmul.f32 %v2703_v56, %v205_v58  ;;  %v203_v60 = vsel %vm202_vm4, %v2701_v46, %v199_v57 }
 0x12b   :  { %v214_v63 = vmul.f32 %v203_v60, %v3144_v13  ;;  %v243_v13 = vld [vmem:[#allocation10] sm:$0x3] }
 0x12c   :  { %v207_v61 = vmul.f32 0.5, %v206_v59  ;;  %v245_v14 = vperm.slane %v243_v13, 0  ;;  %v246_v15 = vperm.slane %v243_v13, 1 }
 0x12d   :  { %v219_v4 = vmul.f32 %v2674_v0, %v214_v63 }
 0x12e   :  { %v208_v62 = vsub.f32 1.5, %v207_v61 }
 0x12f   :  { %v3207_v7 = vadd.f32 %v2675_v5, %v219_v4 }
 0x130   :  { %v209_v1 = vmul.f32 %v2703_v56, %v208_v62 }
 0x132   :  { %v213_v2 = vsel %vm212_vm7, %v2703_v56, %v209_v1 }
 0x133   :  { %v215_v3 = vmul.f32 %v213_v2, %v3150_v18 }
 0x135   :  { %v220_v6 = vmul.f32 %v2674_v0, %v215_v3 }
 0x137   :  { %v3209_v8 = vadd.f32 %v2675_v5, %v220_v6 }
 0x139   :  { %v234_v9 = vpack.c.bf16 %v3209_v8, %v3207_v7 }
 0x13b   :  { %2337 = vmatmul.msk.bf16.vlgmr.msra.gmra.mxu1 %vm164_vm0, %v234_v9 }
 0x14b   :  { %2338 = vmatmul.msk.bf16.vlgmr.msrb.gmra.mxu1 %vm164_vm0, %v234_v9 }
 0x1b8   :  { %v301_v11 = vpop.f32.mrf.mxu1 }
 0x1b9   :  { %v302_v17 = vadd.f32 %v301_v11, %v245_v14 }
 0x1c0   :  { %v303_v12 = vpop.f32.mrf.mxu1 }
 0x1c1   :  { %v304_v21 = vadd.f32 %v303_v12, %v245_v14 }
 0x1c8   :  { %v315_v16 = vpop.f32.mrf.mxu1 }
 0x1c9   :  { %v316_v18 = vadd.f32 %v315_v16, %v246_v15 }
 0x1cb   :  { %v3215_v19 = vpack.c.bf16 %v316_v18, %v302_v17  ;;  %v2676_v17 = vld [vmem:[#allocation5] ss:$0 sm:$0xff] }
 0x1cd   :  { %332 = vrot.lane.b32.xlu0 %v3215_v19, %s3018_s23  ;;  %324 = vrot.lane.b32.xlu2 %v3215_v19, %s3019_s26  ;;  %v368_v26 = vunpack.c.l.b16 %v3215_v19  ;;  %v336_v57 = vrot.slane %v3215_v19, 4 }
 0x1cf   :  { %v369_v27 = vpack.c.b16 %v368_v26, %v368_v26  ;;  %v759_v61 = vsel %vm757_vm9, %v336_v57, 0 }
 0x1d0   :  { %v317_v20 = vpop.f32.mrf.mxu1 }
 0x1d1   :  { %v318_v22 = vadd.f32 %v317_v20, %v246_v15 }
 0x1d3   :  { %v3221_v23 = vpack.c.bf16 %v318_v22, %v304_v21 }
 0x1d5   :  { %334 = vrot.lane.b32.xlu1 %v3221_v23, %s3018_s23  ;;  %326 = vrot.lane.b32.xlu2 %v3221_v23, %s3019_s26  ;;  %v392_v24 = vunpack.c.l.b16 %v3221_v23  ;;  %v337_v6 = vrot.slane %v3221_v23, 4 }
 0x1d7   :  { %v393_v25 = vpack.c.b16 %v392_v24, %v392_v24  ;;  %v778_v14 = vsel %vm757_vm9, %v337_v6, 0  ;;  %v2678_v24 = vld [vmem:[#allocation5 + $0x2] ss:$0 sm:$0xff] }
 0x1d9   :  { %394 = vrot.lane.b32.xlu0 %v393_v25, %s3007_s27 }
 0x1dd   :  { %328 = vrot.lane.b32.xlu2 %v3215_v19, %s3020_s2 }
 0x1e5   :  { %330 = vrot.lane.b32.xlu2 %v3221_v23, %s3020_s2 }
 0x1ed   :  { %370 = vrot.lane.b32.xlu2 %v369_v27, %s3007_s27  ;;  %v2677_v27 = vld [vmem:[#allocation5 + $0x1] ss:$0 sm:$0xff] }
 0x227   :  { %v3235_v28 = vpop.permute.xlu2 %324 }
 0x228   :  { %v415_v29 = vunpack.c.l.b16 %v3235_v28  ;;  %v338_v63 = vrot.slane %v3235_v28, 4 }
 0x22a   :  { %v416_v30 = vpack.c.b16 %v415_v29, %v415_v29  ;;  %v797_v3 = vsel %vm757_vm9, %v338_v63, 0 }
 0x22c   :  { %417 = vrot.lane.b32.xlu2 %v416_v30, %s3007_s27 }
 0x22f   :  { %v327_v31 = vpop.permute.xlu2 %326 }
 0x230   :  { %v438_v32 = vunpack.c.l.b16 %v327_v31  ;;  %v339_v56 = vrot.slane %v327_v31, 4 }
 0x232   :  { %v439_v33 = vpack.c.b16 %v438_v32, %v438_v32  ;;  %v816_v60 = vsel %vm757_vm9, %v339_v56, 0  ;;  %v2679_v32 = vld [vmem:[#allocation5 + $0x3] ss:$0 sm:$0xff] }
 0x234   :  { %440 = vrot.lane.b32.xlu1 %v439_v33, %s3007_s27  ;;  %v2680_v33 = vld [vmem:[#allocation5 + $0x4] ss:$0 sm:$0xff] }
 0x237   :  { %v329_v34 = vpop.permute.xlu2 %328 }
 0x238   :  { %v461_v35 = vunpack.c.l.b16 %v329_v34  ;;  %v340_v62 = vrot.slane %v329_v34, 4 }
 0x23a   :  { %v462_v36 = vpack.c.b16 %v461_v35, %v461_v35  ;;  %v835_v2 = vsel %vm757_vm9, %v340_v62, 0 }
 0x23c   :  { %463 = vrot.lane.b32.xlu1 %v462_v36, %s3007_s27 }
 0x23f   :  { %v3241_v37 = vpop.permute.xlu0 %332  ;;  %v3243_v38 = vpop.permute.xlu2 %330 }
 0x240   :  { %v507_v39 = vunpack.c.l.b16 %v3241_v37  ;;  %v484_v41 = vunpack.c.l.b16 %v3243_v38  ;;  %v342_v5 = vrot.slane %v3241_v37, 4  ;;  %v341_v15 = vrot.slane %v3243_v38, 4 }
 0x242   :  { %v508_v40 = vpack.c.b16 %v507_v39, %v507_v39  ;;  %v485_v46 = vpack.c.b16 %v484_v41, %v484_v41  ;;  %v873_v13 = vsel %vm757_vm9, %v342_v5, 0  ;;  %v854_v16 = vsel %vm757_vm9, %v341_v15, 0 }
 0x244   :  { %509 = vrot.lane.b32.xlu0 %v508_v40, %s3007_s27 }
 0x247   :  { %v335_v42 = vpop.permute.xlu1 %334  ;;  %v371_v43 = vpop.permute.xlu2 %370 }
 0x248   :  { %v377_v44 = vsel %vm372_vm8, %v371_v43, 0  ;;  %v530_v45 = vunpack.c.l.b16 %v335_v42  ;;  %v343_v4 = vrot.slane %v335_v42, 4  ;;  %v2682_v43 = vld [vmem:[#allocation5 + $0x7] ss:$0 sm:$0xff] }
 0x249   :  { %386 = vmatpush.bf16.xpose.msra.mxu2 %v377_v44 }
 0x24a   :  { %v531_v47 = vpack.c.b16 %v530_v45, %v530_v45  ;;  %v892_v12 = vsel %vm757_vm9, %v343_v4, 0 }
 0x24b   :  { %v395_v48 = vpop.permute.xlu0 %394 }
 0x24c   :  { %486 = vrot.lane.b32.xlu0 %v485_v46, %s3007_s27  ;;  %532 = vrot.lane.b32.xlu2 %v531_v47, %s3007_s27  ;;  %v400_v49 = vsel %vm372_vm8, %v395_v48, 0 }
 0x24d   :  { %409 = vmatpush.bf16.xpose.msra.mxu3 %v400_v49  ;;  %v2683_v49 = vld [vmem:[#allocation5 + $0x5] ss:$0 sm:$0xff] }
 0x250   :  { %2339 = vmatmul.msk.bf16.vlgmr.msra.gmra.mxu2 %vm372_vm8, %v3215_v19 }
 0x254   :  { %2340 = vmatmul.msk.bf16.vlgmr.msra.gmra.mxu3 %vm372_vm8, %v3221_v23 }
 0x286   :  { %v418_v50 = vpop.permute.xlu2 %417 }
 0x287   :  { %v423_v51 = vsel %vm372_vm8, %v418_v50, 0 }
 0x288   :  { %432 = vmatpush.bf16.xpose.msrb.mxu2 %v423_v51 }
 0x28f   :  { %2341 = vmatmul.msk.bf16.vlgmr.msrb.gmra.mxu2 %vm372_vm8, %v3235_v28 }
 0x2a6   :  { %v441_v52 = vpop.permute.xlu1 %440  ;;  %v533_v53 = vpop.permute.xlu2 %532 }
 0x2a7   :  { %v538_v54 = vsel %vm372_vm8, %v533_v53, 0  ;;  %v446_v55 = vsel %vm372_vm8, %v441_v52, 0 }
 0x2a8   :  { %455 = vmatpush.bf16.xpose.msrb.mxu3 %v446_v55 }
 0x2ae   :  { %v464_v58 = vpop.permute.xlu1 %463 }
 0x2af   :  { %2342 = vmatmul.msk.bf16.vlgmr.msrb.gmra.mxu3 %vm372_vm8, %v327_v31  ;;  %v469_v59 = vsel %vm372_vm8, %v464_v58, 0 }
 0x2b0   :  { %547 = vmatpush.bf16.xpose.msra.mxu3 %v538_v54  ;;  %478 = vmatpush.bf16.xpose.msra.mxu0 %v469_v59 }
 0x2b6   :  { %v510_v0 = vpop.permute.xlu0 %509 }
 0x2b7   :  { %v515_v1 = vsel %vm372_vm8, %v510_v0, 0  ;;  %2343 = vmatmul.msk.bf16.vlgmr.msra.gmra.mxu0 %vm372_vm8, %v329_v34 }
 0x2b8   :  { %825 = vmatpush.bf16.msrb.mxu3 %v816_v60  ;;  %768 = vmatpush.bf16.msrb.mxu0 %v759_v61 }
 0x2b9   :  { %524 = vmatpush.bf16.xpose.msra.mxu2 %v515_v1 }
 0x2bc   :  { %844 = vmatpush.bf16.msra.mxu0 %v835_v2 }
 0x2be   :  { %v487_v9 = vpop.permute.xlu0 %486 }
 0x2bf   :  { %v492_v11 = vsel %vm372_vm8, %v487_v9, 0  ;;  %2346 = vmatmul.msk.bf16.vlgmr.msra.gmra.mxu3 %vm372_vm8, %v335_v42  ;;  %v2681_v42 = vld [vmem:[#allocation5 + $0x6] ss:$0 sm:$0xff] }
 0x2c0   :  { %2345 = vmatmul.msk.bf16.vlgmr.msra.gmra.mxu2 %vm372_vm8, %v3241_v37  ;;  %901 = vmatpush.bf16.msra.mxu3 %v892_v12 }
 0x2c1   :  { %806 = vmatpush.bf16.msrb.mxu2 %v797_v3  ;;  %501 = vmatpush.bf16.xpose.msra.mxu1 %v492_v11 }
 0x2c5   :  { %882 = vmatpush.bf16.msra.mxu2 %v873_v13 }
 0x2c8   :  { %2344 = vmatmul.msk.bf16.vlgmr.msra.gmra.mxu1 %vm372_vm8, %v3243_v38 }
 0x2c9   :  { %787 = vmatpush.bf16.msrb.mxu1 %v778_v14 }
 0x2cd   :  { %863 = vmatpush.bf16.msra.mxu1 %v854_v16 }
 0x2d3   :  { %v388_v18 = vpop.f32.mrf.mxu2 }
 0x2d4   :  { %v389_v19 = vadd.f32 %v2676_v17, %v388_v18 }
 0x2d6   :  { %v554_v20 = vsel %vm553_vm10, %v389_v19, -inf }
 0x2d7   :  { %v411_v21 = vpop.f32.mrf.mxu3  ;;  %555 = vmax.xlane.f32.xlu0 %v554_v20 }
 0x2d8   :  { %v412_v29 = vadd.f32 %v2677_v27, %v411_v21 }
 0x2da   :  { %v557_v31 = vsel %vm553_vm10, %v412_v29, -inf }
 0x2db   :  { %v390_v22 = vpop.f32.mrf.mxu2 }
 0x2df   :  { %v413_v23 = vpop.f32.mrf.mxu3 }
 0x312   :  { %v434_v25 = vpop.f32.mrf.mxu2 }
 0x313   :  { %v435_v26 = vadd.f32 %v2678_v24, %v434_v25 }
 0x315   :  { %v560_v28 = vsel %vm553_vm10, %v435_v26, -inf }
 0x316   :  { %561 = vmax.xlane.f32.xlu2 %v560_v28 }
 0x31a   :  { %v436_v30 = vpop.f32.mrf.mxu2 }
 0x31e   :  { %558 = vmax.xlane.f32.xlu2 %v557_v31 }
 0x332   :  { %v457_v34 = vpop.f32.mrf.mxu3 }
 0x333   :  { %v458_v35 = vadd.f32 %v2679_v32, %v457_v34 }
 0x334   :  { %v480_v36 = vpop.f32.mrf.mxu0 }
 0x335   :  { %v481_v37 = vadd.f32 %v2680_v33, %v480_v36  ;;  %v563_v38 = vsel %vm553_vm10, %v458_v35, -inf }
 0x336   :  { %564 = vmax.xlane.f32.xlu1 %v563_v38 }
 0x337   :  { %v566_v39 = vsel %vm553_vm10, %v481_v37, -inf }
 0x338   :  { %567 = vmax.xlane.f32.xlu2 %v566_v39 }
 0x33a   :  { %v459_v40 = vpop.f32.mrf.mxu3 }
 0x33c   :  { %v482_v41 = vpop.f32.mrf.mxu0 }
 0x342   :  { %v549_v45 = vpop.f32.mrf.mxu3 }
 0x343   :  { %v526_v44 = vpop.f32.mrf.mxu2  ;;  %v550_v47 = vadd.f32 %v2682_v43, %v549_v45 }
 0x344   :  { %v527_v46 = vadd.f32 %v2681_v42, %v526_v44 }
 0x345   :  { %v503_v48 = vpop.f32.mrf.mxu1  ;;  %v575_v51 = vsel %vm553_vm10, %v550_v47, -inf }
 0x346   :  { %v572_v50 = vsel %vm553_vm10, %v527_v46, -inf  ;;  %576 = vmax.xlane.f32.xlu0 %v575_v51  ;;  %v504_v52 = vadd.f32 %v2683_v49, %v503_v48 }
 0x347   :  { %573 = vmax.xlane.f32.xlu1 %v572_v50 }
 0x348   :  { %v569_v59 = vsel %vm553_vm10, %v504_v52, -inf }
 0x34a   :  { %v556_v53 = vpop.xlane.xlu0 %555  ;;  %v551_v56 = vpop.f32.mrf.mxu3 }
 0x34b   :  { %v528_v54 = vpop.f32.mrf.mxu2  ;;  %v578_v55 = vsub.f32 %v389_v19, %v556_v53 }
 0x34d   :  { %v505_v57 = vpop.f32.mrf.mxu1  ;;  %v586_v58 = vmul.f32 1.442695, %v578_v55 }
 0x34f   :  { %570 = vmax.xlane.f32.xlu1 %v569_v59  ;;  %2704 = vpow2.f32 %v586_v58 }
 0x355   :  { %v3292_v60 = vpop.eup %2704 }
 0x356   :  { %v602_v61 = vsel %vm553_vm10, %v3292_v60, 0.0 }
 0x357   :  { %603 = vadd.xlane.f32.xlu1 %v602_v61 }
 0x389   :  { %v562_v62 = vpop.xlane.xlu2 %561 }
 0x38a   :  { %v580_v63 = vsub.f32 %v435_v26, %v562_v62 }
 0x38c   :  { %v590_v0 = vmul.f32 1.442695, %v580_v63 }
 0x38e   :  { %2706 = vpow2.f32 %v590_v0 }
 0x391   :  { %v559_v1 = vpop.xlane.xlu2 %558 }
 0x392   :  { %v579_v2 = vsub.f32 %v412_v29, %v559_v1 }
 0x394   :  { %v3296_v3 = vpop.eup %2706  ;;  %v588_v4 = vmul.f32 1.442695, %v579_v2 }
 0x395   :  { %v608_v5 = vsel %vm553_vm10, %v3296_v3, 0.0 }
 0x396   :  { %2708 = vpow2.f32 %v588_v4  ;;  %609 = vadd.xlane.f32.xlu0 %v608_v5 }
 0x39c   :  { %v3300_v6 = vpop.eup %2708 }
 0x39d   :  { %v605_v9 = vsel %vm553_vm10, %v3300_v6, 0.0 }
 0x39e   :  { %606 = vadd.xlane.f32.xlu0 %v605_v9 }
 0x3a9   :  { %v565_v11 = vpop.xlane.xlu1 %564 }
 0x3aa   :  { %v581_v12 = vsub.f32 %v458_v35, %v565_v11 }
 0x3ab   :  { %v568_v13 = vpop.xlane.xlu2 %567 }
 0x3ac   :  { %v592_v14 = vmul.f32 1.442695, %v581_v12  ;;  %v582_v15 = vsub.f32 %v481_v37, %v568_v13 }
 0x3ae   :  { %2710 = vpow2.f32 %v592_v14  ;;  %v594_v16 = vmul.f32 1.442695, %v582_v15 }
 0x3b0   :  { %2712 = vpow2.f32 %v594_v16 }
 0x3b4   :  { %v3304_v17 = vpop.eup %2710 }
 0x3b5   :  { %v611_v18 = vsel %vm553_vm10, %v3304_v17, 0.0 }
 0x3b6   :  { %v3308_v19 = vpop.eup %2712  ;;  %612 = vadd.xlane.f32.xlu2 %v611_v18 }
 0x3b7   :  { %v614_v20 = vsel %vm553_vm10, %v3308_v19, 0.0 }
 0x3b8   :  { %615 = vadd.xlane.f32.xlu0 %v614_v20 }
 0x3b9   :  { %v577_v22 = vpop.xlane.xlu0 %576 }
 0x3ba   :  { %v574_v21 = vpop.xlane.xlu1 %573  ;;  %v585_v24 = vsub.f32 %v550_v47, %v577_v22 }
 0x3bb   :  { %v584_v23 = vsub.f32 %v527_v46, %v574_v21 }
 0x3bc   :  { %v600_v26 = vmul.f32 1.442695, %v585_v24 }
 0x3bd   :  { %v598_v25 = vmul.f32 1.442695, %v584_v23 }
 0x3bf   :  { %2714 = vpow2.f32 %v598_v25 }
 0x3c0   :  { %2716 = vpow2.f32 %v600_v26 }
 0x3c2   :  { %v571_v27 = vpop.xlane.xlu1 %570 }
 0x3c3   :  { %v583_v28 = vsub.f32 %v504_v52, %v571_v27 }
 0x3c5   :  { %v3312_v29 = vpop.eup %2714  ;;  %v596_v30 = vmul.f32 1.442695, %v583_v28 }
 0x3c6   :  { %v3314_v31 = vpop.eup %2716  ;;  %v620_v32 = vsel %vm553_vm10, %v3312_v29, 0.0 }
 0x3c7   :  { %2718 = vpow2.f32 %v596_v30  ;;  %621 = vadd.xlane.f32.xlu2 %v620_v32  ;;  %v623_v33 = vsel %vm553_vm10, %v3314_v31, 0.0 }
 0x3c8   :  { %624 = vadd.xlane.f32.xlu1 %v623_v33 }
 0x3ca   :  { %v604_v34 = vpop.xlane.xlu1 %603 }
 0x3cb   :  { %2720 = vrcp.f32 %v604_v34  ;;  %v637_v40 = vand.u32 2147483648, %v604_v34  ;;  %v635_v42 = vand.u32 2147483647, %v604_v34  ;;  %vm631_vm12 = vweird.f32 %v604_v34 }
 0x3cd   :  { %v3320_v35 = vpop.eup %2718  ;;  %v638_v44 = vor.u32 1.1754944e-38, %v637_v40  ;;  %vm636_vm14 = vcmp.eq.f32.partialorder %v635_v42, 8.507059e+37 }
 0x3ce   :  { %v617_v36 = vsel %vm553_vm10, %v3320_v35, 0.0 }
 0x3cf   :  { %618 = vadd.xlane.f32.xlu2 %v617_v36 }
 0x3d1   :  { %v2721_v37 = vpop.eup %2720 }
 0x3d2   :  { %v627_v38 = vmul.f32 %v2721_v37, %v604_v34  ;;  %vm632_vm11 = vweird.f32 %v2721_v37 }
 0x3d3   :  { %vm633_vm13 = vmor %vm631_vm12, %vm632_vm11 }
 0x3d4   :  { %v628_v39 = vsub.f32 1.0, %v627_v38 }
 0x3d6   :  { %v629_v41 = vmul.f32 %v2721_v37, %v628_v39 }
 0x3d8   :  { %v630_v43 = vadd.f32 %v2721_v37, %v629_v41 }
 0x3da   :  { %v634_v45 = vsel %vm633_vm13, %v2721_v37, %v630_v43 }
 0x3db   :  { %v639_v46 = vsel %vm636_vm14, %v638_v44, %v634_v45 }
 0x3dc   :  { %v640_v47 = vmul.f32 %v3292_v60, %v639_v46 }
 0x3de   :  { %v746_v48 = vpack.c.bf16 %v640_v47, %v640_v47 }
 0x3e0   :  { %2347 = vmatmul.msk.bf16.vlgmr.msrb.gmra.mxu0 %vm553_vm10, %v746_v48 }
 0x409   :  { %v610_v49 = vpop.xlane.xlu0 %609 }
 0x40a   :  { %2722 = vrcp.f32 %v610_v49  ;;  %v667_v54 = vand.u32 2147483648, %v610_v49  ;;  %v665_v56 = vand.u32 2147483647, %v610_v49  ;;  %vm661_vm1 = vweird.f32 %v610_v49 }
 0x40c   :  { %v668_v59 = vor.u32 1.1754944e-38, %v667_v54  ;;  %vm666_vm3 = vcmp.eq.f32.partialorder %v665_v56, 8.507059e+37 }
 0x410   :  { %v2723_v50 = vpop.eup %2722 }
 0x411   :  { %v657_v51 = vmul.f32 %v2723_v50, %v610_v49  ;;  %v607_v52 = vpop.xlane.xlu0 %606  ;;  %vm662_vm15 = vweird.f32 %v2723_v50 }
 0x412   :  { %2724 = vrcp.f32 %v607_v52  ;;  %vm663_vm2 = vmor %vm661_vm1, %vm662_vm15  ;;  %v652_v1 = vand.u32 2147483648, %v607_v52  ;;  %v650_v4 = vand.u32 2147483647, %v607_v52  ;;  %vm646_vm5 = vweird.f32 %v607_v52 }
 0x413   :  { %v658_v53 = vsub.f32 1.0, %v657_v51 }
 0x414   :  { %v653_v11 = vor.u32 1.1754944e-38, %v652_v1  ;;  %vm651_vm7 = vcmp.eq.f32.partialorder %v650_v4, 8.507059e+37 }
 0x415   :  { %v659_v55 = vmul.f32 %v2723_v50, %v658_v53 }
 0x417   :  { %v660_v57 = vadd.f32 %v2723_v50, %v659_v55 }
 0x418   :  { %v2725_v58 = vpop.eup %2724 }
 0x419   :  { %v664_v60 = vsel %vm663_vm2, %v2723_v50, %v660_v57  ;;  %v642_v61 = vmul.f32 %v2725_v58, %v607_v52  ;;  %vm647_vm4 = vweird.f32 %v2725_v58 }
 0x41a   :  { %v669_v62 = vsel %vm666_vm3, %v668_v59, %v664_v60  ;;  %vm648_vm6 = vmor %vm646_vm5, %vm647_vm4 }
 0x41b   :  { %v670_v63 = vmul.f32 %v3296_v3, %v669_v62  ;;  %v643_v0 = vsub.f32 1.0, %v642_v61 }
 0x41d   :  { %v644_v2 = vmul.f32 %v2725_v58, %v643_v0  ;;  %v748_v5 = vpack.c.bf16 %v670_v63, %v670_v63 }
 0x41f   :  { %v645_v9 = vadd.f32 %v2725_v58, %v644_v2  ;;  %2349 = vmatmul.msk.bf16.vlgmr.msrb.gmra.mxu2 %vm553_vm10, %v748_v5 }
 0x421   :  { %v649_v12 = vsel %vm648_vm6, %v2725_v58, %v645_v9 }
 0x422   :  { %v654_v13 = vsel %vm651_vm7, %v653_v11, %v649_v12 }
 0x423   :  { %v655_v14 = vmul.f32 %v3300_v6, %v654_v13 }
 0x425   :  { %v747_v15 = vpack.c.bf16 %v655_v14, %v655_v14 }
 0x427   :  { %2348 = vmatmul.msk.bf16.vlgmr.msrb.gmra.mxu1 %vm553_vm10, %v747_v15 }
 0x429   :  { %v613_v3 = vpop.xlane.xlu2 %612 }
 0x42a   :  { %2726 = vrcp.f32 %v613_v3  ;;  %v682_v24 = vand.u32 2147483648, %v613_v3  ;;  %v680_v26 = vand.u32 2147483647, %v613_v3  ;;  %vm676_vm12 = vweird.f32 %v613_v3 }
 0x42b   :  { %v616_v16 = vpop.xlane.xlu0 %615 }
 0x42c   :  { %2728 = vrcp.f32 %v616_v16  ;;  %v697_v28 = vand.u32 2147483648, %v616_v16  ;;  %v695_v32 = vand.u32 2147483647, %v616_v16  ;;  %v683_v33 = vor.u32 1.1754944e-38, %v682_v24 }
 0x42d   :  { %vm681_vm15 = vcmp.eq.f32.partialorder %v680_v26, 8.507059e+37  ;;  %vm691_vm1 = vweird.f32 %v616_v16 }
 0x42e   :  { %v698_v39 = vor.u32 1.1754944e-38, %v697_v28  ;;  %vm696_vm3 = vcmp.eq.f32.partialorder %v695_v32, 8.507059e+37 }
 0x430   :  { %v2727_v18 = vpop.eup %2726 }
 0x431   :  { %v672_v20 = vmul.f32 %v2727_v18, %v613_v3  ;;  %vm677_vm11 = vweird.f32 %v2727_v18 }
 0x432   :  { %v2729_v21 = vpop.eup %2728  ;;  %vm678_vm14 = vmor %vm676_vm12, %vm677_vm11 }
 0x433   :  { %v673_v22 = vsub.f32 1.0, %v672_v20  ;;  %v687_v23 = vmul.f32 %v2729_v21, %v616_v16  ;;  %vm692_vm13 = vweird.f32 %v2729_v21 }
 0x434   :  { %vm693_vm2 = vmor %vm691_vm1, %vm692_vm13 }
 0x435   :  { %v674_v25 = vmul.f32 %v2727_v18, %v673_v22  ;;  %v688_v27 = vsub.f32 1.0, %v687_v23 }
 0x437   :  { %v675_v6 = vadd.f32 %v2727_v18, %v674_v25  ;;  %v689_v30 = vmul.f32 %v2729_v21, %v688_v27 }
 0x439   :  { %v679_v34 = vsel %vm678_vm14, %v2727_v18, %v675_v6  ;;  %v690_v36 = vadd.f32 %v2729_v21, %v689_v30 }
 0x43a   :  { %v622_v37 = vpop.xlane.xlu2 %621  ;;  %v684_v38 = vsel %vm681_vm15, %v683_v33, %v679_v34 }
 0x43b   :  { %v625_v40 = vpop.xlane.xlu1 %624  ;;  %2730 = vrcp.f32 %v622_v37  ;;  %v685_v41 = vmul.f32 %v3304_v17, %v684_v38  ;;  %v694_v42 = vsel %vm693_vm2, %v2729_v21, %v690_v36  ;;  %v727_v53 = vand.u32 2147483648, %v622_v37 }
 0x43c   :  { %2732 = vrcp.f32 %v625_v40  ;;  %v699_v43 = vsel %vm696_vm3, %v698_v39, %v694_v42  ;;  %v742_v54 = vand.u32 2147483648, %v625_v40  ;;  %v725_v56 = vand.u32 2147483647, %v622_v37  ;;  %v2586_v42 = vld [vmem:[%s3698_s6 + $0x18] sm:$0xff] }
 0x43d   :  { %v700_v44 = vmul.f32 %v3308_v19, %v699_v43  ;;  %v749_v45 = vpack.c.bf16 %v685_v41, %v685_v41  ;;  %v740_v57 = vand.u32 2147483647, %v625_v40  ;;  %vm721_vm6 = vweird.f32 %v622_v37  ;;  %983 = vmatpush.bf16.msrb.mxu0 %v2586_v42  ;;  %v2585_v43 = vld [vmem:[%s3698_s6 + $0x10] sm:$0xff] }
 0x43e   :  { %vm736_vm7 = vweird.f32 %v625_v40  ;;  %v728_v61 = vor.u32 1.1754944e-38, %v727_v53  ;;  %v743_v62 = vor.u32 1.1754944e-38, %v742_v54  ;;  %vm726_vm13 = vcmp.eq.f32.partialorder %v725_v56, 8.507059e+37 }
 0x43f   :  { %2350 = vmatmul.msk.bf16.vlgmr.msrb.gmra.mxu3 %vm553_vm10, %v749_v45  ;;  %v750_v46 = vpack.c.bf16 %v700_v44, %v700_v44  ;;  %vm741_vm14 = vcmp.eq.f32.partialorder %v740_v57, 8.507059e+37  ;;  %v2584_v44 = vld [vmem:[%s3698_s6 + $0x8] sm:$0xff]  ;;  %v2583_v45 = vld [vmem:[%s3698_s6] sm:$0xff] }
 0x441   :  { %v2731_v47 = vpop.eup %2730  ;;  %2351 = vmatmul.msk.bf16.vlgmr.msra.gmra.mxu0 %vm553_vm10, %v750_v46 }
 0x442   :  { %v2733_v48 = vpop.eup %2732  ;;  %v717_v49 = vmul.f32 %v2731_v47, %v622_v37  ;;  %v619_v50 = vpop.xlane.xlu2 %618  ;;  %vm722_vm4 = vweird.f32 %v2731_v47  ;;  %984 = vmatpush.bf16.msrb.mxu0 %v2585_v43 }
 0x443   :  { %v732_v51 = vmul.f32 %v2733_v48, %v625_v40  ;;  %2734 = vrcp.f32 %v619_v50  ;;  %vm737_vm5 = vweird.f32 %v2733_v48  ;;  %vm723_vm11 = vmor %vm721_vm6, %vm722_vm4  ;;  %v712_v12 = vand.u32 2147483648, %v619_v50 }
 0x444   :  { %v718_v52 = vsub.f32 1.0, %v717_v49  ;;  %vm738_vm12 = vmor %vm736_vm7, %vm737_vm5  ;;  %v710_v14 = vand.u32 2147483647, %v619_v50  ;;  %vm706_vm1 = vweird.f32 %v619_v50  ;;  %vm933_vm4 = vcmask 261120  }
 0x445   :  { %v733_v17 = vsub.f32 1.0, %v732_v51  ;;  %v713_v18 = vor.u32 1.1754944e-38, %v712_v12  ;;  %vm936_vm5 = vcmask 392192  }
 0x446   :  { %v719_v55 = vmul.f32 %v2731_v47, %v718_v52  ;;  %vm711_vm3 = vcmp.eq.f32.partialorder %v710_v14, 8.507059e+37  ;;  %985 = vmatpush.bf16.msrb.mxu0 %v2584_v44  ;;  %v2686_v44 = vld [vmem:[%s3701_s9] ss:$0 sm:$0xff] }
 0x447   :  { %v734_v19 = vmul.f32 %v2733_v48, %v733_v17 }
 0x448   :  { %v720_v58 = vadd.f32 %v2731_v47, %v719_v55 }
 0x449   :  { %v2735_v59 = vpop.eup %2734  ;;  %v735_v60 = vadd.f32 %v2733_v48, %v734_v19 }
 0x44a   :  { %v724_v63 = vsel %vm723_vm11, %v2731_v47, %v720_v58  ;;  %v702_v0 = vmul.f32 %v2735_v59, %v619_v50  ;;  %vm707_vm15 = vweird.f32 %v2735_v59  ;;  %986 = vmatpush.bf16.msrb.mxu0 %v2583_v45 }
 0x44b   :  { %v739_v1 = vsel %vm738_vm12, %v2733_v48, %v735_v60  ;;  %v729_v2 = vsel %vm726_vm13, %v728_v61, %v724_v63  ;;  %vm708_vm2 = vmor %vm706_vm1, %vm707_vm15  ;;  %v2684_v60 = vld [vmem:[%s3699_s7] ss:$0 sm:$0xff] }
 0x44c   :  { %v744_v4 = vsel %vm741_vm14, %v743_v62, %v739_v1  ;;  %v730_v5 = vmul.f32 %v3312_v29, %v729_v2  ;;  %v703_v9 = vsub.f32 1.0, %v702_v0 }
 0x44d   :  { %v745_v11 = vmul.f32 %v3314_v31, %v744_v4 }
 0x44e   :  { %v704_v13 = vmul.f32 %v2735_v59, %v703_v9  ;;  %v752_v15 = vpack.c.bf16 %v730_v5, %v730_v5 }
 0x44f   :  { %v753_v3 = vpack.c.bf16 %v745_v11, %v745_v11 }
 0x450   :  { %v705_v16 = vadd.f32 %v2735_v59, %v704_v13  ;;  %2353 = vmatmul.msk.bf16.vlgmr.msra.gmra.mxu2 %vm553_vm10, %v752_v15 }
 0x451   :  { %2354 = vmatmul.msk.bf16.vlgmr.msra.gmra.mxu3 %vm553_vm10, %v753_v3 }
 0x452   :  { %v709_v20 = vsel %vm708_vm2, %v2735_v59, %v705_v16 }
 0x453   :  { %v714_v29 = vsel %vm711_vm3, %v713_v18, %v709_v20  ;;  %v2589_v20 = vld [vmem:[#allocation11 + $0x10] sm:$0xff] }
 0x454   :  { %v715_v21 = vmul.f32 %v3320_v35, %v714_v29 }
 0x456   :  { %v751_v31 = vpack.c.bf16 %v715_v21, %v715_v21 }
 0x458   :  { %2352 = vmatmul.msk.bf16.vlgmr.msra.gmra.mxu1 %vm553_vm10, %v751_v31  ;;  %v2588_v31 = vld [vmem:[#allocation11 + $0x8] sm:$0xff] }
 0x45d   :  { %v770_v22 = vpop.f32.mrf.mxu0 }
 0x465   :  { %v772_v23 = vpop.f32.mrf.mxu0 }
 0x466   :  { %v2587_v23 = vld [vmem:[#allocation11] sm:$0xff] }
 0x4a2   :  { %v808_v24 = vpop.f32.mrf.mxu2 }
 0x4a4   :  { %v789_v25 = vpop.f32.mrf.mxu1 }
 0x4aa   :  { %v810_v26 = vpop.f32.mrf.mxu2 }
 0x4ac   :  { %v791_v27 = vpop.f32.mrf.mxu1 }
 0x4be   :  { %v846_v28 = vpop.f32.mrf.mxu0 }
 0x4c2   :  { %v827_v6 = vpop.f32.mrf.mxu3 }
 0x4c3   :  { %v2644_v30 = vpack.i.bf16 %v827_v6, %v808_v24 }
 0x4c5   :  { %2645 = vrot.lane.b32.xlu1 %v2644_v30, %s3003_s29 }
 0x4c6   :  { %v848_v32 = vpop.f32.mrf.mxu0 }
 0x4ca   :  { %v829_v33 = vpop.f32.mrf.mxu3 }
 0x4d3   :  { %v884_v34 = vpop.f32.mrf.mxu2 }
 0x4d4   :  { %v903_v36 = vpop.f32.mrf.mxu3 }
 0x4d5   :  { %v2654_v37 = vpack.i.bf16 %v903_v36, %v884_v34  ;;  %v865_v35 = vpop.f32.mrf.mxu1 }
 0x4d6   :  { %v2649_v38 = vpack.i.bf16 %v865_v35, %v846_v28 }
 0x4d7   :  { %2655 = vrot.lane.b32.xlu2 %v2654_v37, %s3021_s25 }
 0x4d8   :  { %2650 = vrot.lane.b32.xlu0 %v2649_v38, %s3014_s21 }
 0x4db   :  { %v886_v39 = vpop.f32.mrf.mxu2 }
 0x4dc   :  { %v905_v40 = vpop.f32.mrf.mxu3 }
 0x4dd   :  { %v867_v41 = vpop.f32.mrf.mxu1  ;;  %v2685_v40 = vld [vmem:[%s3700_s8] ss:$0 sm:$0xff] }
 0x531   :  { %v2656_v49 = vpop.permute.xlu2 %2655 }
 0x532   :  { %v2658_v17 = vunpack.i.h.bf16 %v2656_v49  ;;  %v2657_v53 = vunpack.i.l.bf16 %v2656_v49 }
 0x537   :  { %v2646_v46 = vpop.permute.xlu1 %2645 }
 0x538   :  { %v2648_v47 = vunpack.i.h.bf16 %v2646_v46  ;;  %v2647_v48 = vunpack.i.l.bf16 %v2646_v46 }
 0x53a   :  { %v932_v54 = vsel %vm372_vm8, %v789_v25, %v2648_v47  ;;  %v931_v55 = vsel %vm372_vm8, %v770_v22, %v2647_v48 }
 0x54a   :  { %v2651_v50 = vpop.permute.xlu0 %2650 }
 0x54b   :  { %v2653_v51 = vunpack.i.h.bf16 %v2651_v50  ;;  %v2652_v52 = vunpack.i.l.bf16 %v2651_v50 }
 0x54d   :  { %v935_v56 = vsel %vm933_vm4, %v932_v54, %v2653_v51  ;;  %v934_v19 = vsel %vm933_vm4, %v931_v55, %v2652_v52  ;;  %v2598_v51 = vld [vmem:[%s3704_s12 + $0x38] sm:$0xff]  ;;  %v2597_v52 = vld [vmem:[%s3704_s12 + $0x30] sm:$0xff] }
 0x54e   :  { %v938_v57 = vsel %vm936_vm5, %v935_v56, %v2658_v17  ;;  %v937_v58 = vsel %vm936_vm5, %v934_v19, %v2657_v53  ;;  %1192 = vmatpush.bf16.msrb.mxu2 %v2598_v51  ;;  %v2596_v17 = vld [vmem:[%s3704_s12 + $0x28] sm:$0xff]  ;;  %v2595_v53 = vld [vmem:[%s3704_s12 + $0x20] sm:$0xff]  ;;  %v2594_v54 = vld [vmem:[%s3704_s12 + $0x18] sm:$0xff] }
 0x54f   :  { %v939_v59 = vpack.c.bf16 %v938_v57, %v937_v58  ;;  %v2593_v55 = vld [vmem:[%s3704_s12 + $0x10] sm:$0xff]  ;;  %v2687_v56 = vld [vmem:[%s3703_s11] ss:$0 sm:$0xff]  ;;  %v2592_v19 = vld [vmem:[%s3704_s12 + $0x8] sm:$0xff] }
 0x550   :  { %v2591_v58 = vld [vmem:[%s3704_s12] sm:$0xff] }
 0x551   :  { %2371 = vmatmul.msk.bf16.vlgmr.msrb.gmra.mxu0 %vm164_vm0, %v939_v59 }
 0x552   :  { %1193 = vmatpush.bf16.msrb.mxu2 %v2597_v52  ;;  %v2439_v52 = vld [vmem:[%s3696_s4 + $0x50] sm:$0xf] }
 0x556   :  { %1194 = vmatpush.bf16.msrb.mxu2 %v2596_v17  ;;  %v2602_v17 = vld [vmem:[%s3696_s4 + $0x54] sm:$0xf0] }
 0x55a   :  { %1195 = vmatpush.bf16.msrb.mxu2 %v2595_v53  ;;  %v2601_v53 = vld [vmem:[%s3696_s4 + $0x54] sm:$0xf] }
 0x55e   :  { %1196 = vmatpush.bf16.msrb.mxu2 %v2594_v54 }
 0x562   :  { %1197 = vmatpush.bf16.msrb.mxu2 %v2593_v55  ;;  %v2440_v55 = vor.u32 %v2602_v17, %v2439_v52 }
 0x566   :  { %1198 = vmatpush.bf16.msrb.mxu2 %v2592_v19 }
 0x56a   :  { %1199 = vmatpush.bf16.msrb.mxu2 %v2591_v58  ;;  %v2431_v58 = vld [vmem:[%s3696_s4 + $0x40] sm:$0xf] }
 0x5ce   :  { %v988_v61 = vpop.f32.mrf.mxu0 }
 0x5cf   :  { %v989_v62 = vadd.f32 %v2684_v60, %v988_v61 }
 0x5d1   :  { %v993_v63 = vadd.f32 %v989_v62, %v3207_v7 }
 0x5d3   :  { %v997_v0 = vsel %vm164_vm0, %v993_v63, 0.0 }
 0x5d4   :  { %998 = vadd.xlane.f32.xlu0 %v997_v0 }
 0x5d6   :  { %v990_v1 = vpop.f32.mrf.mxu0 }
 0x5d7   :  { %v991_v2 = vadd.f32 %v2684_v60, %v990_v1 }
 0x5d9   :  { %v994_v4 = vadd.f32 %v991_v2, %v3209_v8  ;;  %v2590_v8 = vld [vmem:[#allocation11 + $0x18] sm:$0xff] }
 0x5da   :  { %1095 = vmatpush.bf16.msrb.mxu1 %v2590_v8 }
 0x5db   :  { %v1000_v5 = vsel %vm164_vm0, %v994_v4, 0.0 }
 0x5dc   :  { %1001 = vadd.xlane.f32.xlu1 %v1000_v5 }
 0x5de   :  { %1096 = vmatpush.bf16.msrb.mxu1 %v2589_v20 }
 0x5e2   :  { %1097 = vmatpush.bf16.msrb.mxu1 %v2588_v31 }
 0x5e6   :  { %1098 = vmatpush.bf16.msrb.mxu1 %v2587_v23 }
 0x647   :  { %v999_v9 = vpop.xlane.xlu0 %998 }
 0x648   :  { %v1003_v11 = vmul.f32 %v999_v9, %v3141_v10 }
 0x64a   :  { %v1005_v12 = vsub.f32 %v993_v63, %v1003_v11 }
 0x64c   :  { %v1007_v13 = vmul.f32 %v1005_v12, %v1005_v12 }
 0x64e   :  { %v1009_v14 = vsel %vm164_vm0, %v1007_v13, 0.0 }
 0x64f   :  { %v1002_v15 = vpop.xlane.xlu1 %1001  ;;  %1010 = vadd.xlane.f32.xlu2 %v1009_v14 }
 0x650   :  { %v1004_v7 = vmul.f32 %v1002_v15, %v3141_v10 }
 0x652   :  { %v1006_v3 = vsub.f32 %v994_v4, %v1004_v7 }
 0x654   :  { %v1008_v16 = vmul.f32 %v1006_v3, %v1006_v3 }
 0x656   :  { %v1012_v18 = vsel %vm164_vm0, %v1008_v16, 0.0 }
 0x657   :  { %1013 = vadd.xlane.f32.xlu0 %v1012_v18 }
 0x6c2   :  { %v1011_v29 = vpop.xlane.xlu2 %1010 }
 0x6c3   :  { %v1015_v21 = vmul.f32 %v1011_v29, %v3141_v10  ;;  %v2688_v29 = vld [vmem:[%s3705_s13] ss:$0 sm:$0xff] }
 0x6c5   :  { %v1017_v22 = vadd.f32 1e-12, %v1015_v21 }
 0x6c7   :  { %2736 = vrsqrt.f32 %v1017_v22  ;;  %vm1025_vm7 = vweird.f32 %v1017_v22 }
 0x6ca   :  { %v1014_v24 = vpop.xlane.xlu0 %1013 }
 0x6cb   :  { %v1016_v25 = vmul.f32 %v1014_v24, %v3141_v10 }
 0x6cd   :  { %v2737_v26 = vpop.eup %2736  ;;  %v1018_v27 = vadd.f32 1e-12, %v1016_v25 }
 0x6ce   :  { %v1020_v28 = vmul.f32 %v2737_v26, %v1017_v22  ;;  %vm1026_vm6 = vweird.f32 %v2737_v26 }
 0x6cf   :  { %2738 = vrsqrt.f32 %v1018_v27  ;;  %vm1027_vm11 = vmor %vm1025_vm7, %vm1026_vm6  ;;  %vm1035_vm13 = vweird.f32 %v1018_v27 }
 0x6d0   :  { %v1021_v6 = vmul.f32 %v2737_v26, %v1020_v28 }
 0x6d2   :  { %v1022_v30 = vmul.f32 0.5, %v1021_v6 }
 0x6d4   :  { %v1023_v32 = vsub.f32 1.5, %v1022_v30 }
 0x6d5   :  { %v2739_v33 = vpop.eup %2738 }
 0x6d6   :  { %v1024_v34 = vmul.f32 %v2737_v26, %v1023_v32  ;;  %v1030_v36 = vmul.f32 %v2739_v33, %v1018_v27  ;;  %vm1036_vm12 = vweird.f32 %v2739_v33 }
 0x6d7   :  { %vm1037_vm14 = vmor %vm1035_vm13, %vm1036_vm12 }
 0x6d8   :  { %v1031_v37 = vmul.f32 %v2739_v33, %v1030_v36  ;;  %v1028_v35 = vsel %vm1027_vm11, %v2737_v26, %v1024_v34 }
 0x6d9   :  { %v1039_v41 = vmul.f32 %v1028_v35, %v1005_v12 }
 0x6da   :  { %v1032_v38 = vmul.f32 0.5, %v1031_v37 }
 0x6db   :  { %v1044_v45 = vmul.f32 %v2685_v40, %v1039_v41  ;;  %v2605_v41 = vld [vmem:[%s3696_s4 + $0x74] sm:$0xf] }
 0x6dc   :  { %v1033_v39 = vsub.f32 1.5, %v1032_v38 }
 0x6dd   :  { %v1049_v48 = vadd.f32 %v2686_v44, %v1044_v45  ;;  %v2447_v45 = vld [vmem:[%s3696_s4 + $0x60] sm:$0xf] }
 0x6de   :  { %v1034_v42 = vmul.f32 %v2739_v33, %v1033_v39  ;;  %v2455_v39 = vld [vmem:[%s3696_s4 + $0x70] sm:$0xf] }
 0x6e0   :  { %v1038_v43 = vsel %vm1037_vm14, %v2739_v33, %v1034_v42 }
 0x6e1   :  { %v1040_v46 = vmul.f32 %v1038_v43, %v1006_v3  ;;  %v2457_v43 = vld [vmem:[%s3696_s4 + $0x78] sm:$0xf0] }
 0x6e3   :  { %v1045_v47 = vmul.f32 %v2685_v40, %v1040_v46  ;;  %v2606_v40 = vld [vmem:[%s3696_s4 + $0x74] sm:$0xf0]  ;;  %v2604_v46 = vld [vmem:[%s3696_s4 + $0x64] sm:$0xf0] }
 0x6e4   :  { %v2456_v42 = vor.u32 %v2606_v40, %v2455_v39 }
 0x6e5   :  { %v1050_v49 = vadd.f32 %v2686_v44, %v1045_v47  ;;  %v2460_v44 = vor.u32 %v2605_v41, %v2457_v43  ;;  %v2603_v47 = vld [vmem:[%s3696_s4 + $0x64] sm:$0xf] }
 0x6e6   :  { %1328 = vmatpush.bf16.msrb.mxu3 %v2456_v42 }
 0x6e7   :  { %v1051_v50 = vpack.c.bf16 %v1050_v49, %v1049_v48  ;;  %1342 = vmatpush.bf16.msra.mxu0 %v2460_v44 }
 0x6e9   :  { %2388 = vmatmul.msk.bf16.vlgmr.msrb.gmra.mxu1 %vm164_vm0, %v1051_v50 }
 0x766   :  { %v1100_v57 = vpop.f32.mrf.mxu1 }
 0x767   :  { %v1101_v59 = vadd.f32 %v2687_v56, %v1100_v57 }
 0x769   :  { %v1105_v60 = vmul.f32 %v1101_v59, %v1101_v59 }
 0x76b   :  { %v1107_v61 = vmul.f32 %v1105_v60, %v1101_v59 }
 0x76d   :  { %v1109_v62 = vmul.f32 0.044715, %v1107_v61  ;;  %v2599_v61 = vld [vmem:[%s3696_s4 + $0x44] sm:$0xf] }
 0x76e   :  { %v1102_v63 = vpop.f32.mrf.mxu1 }
 0x76f   :  { %v1111_v0 = vadd.f32 %v1109_v62, %v1101_v59  ;;  %v1103_v1 = vadd.f32 %v2687_v56, %v1102_v63  ;;  %v2441_v56 = vld [vmem:[%s3696_s4 + $0x58] sm:$0xf0]  ;;  %v2433_v62 = vld [vmem:[%s3696_s4 + $0x48] sm:$0xf0] }
 0x770   :  { %v2444_v19 = vor.u32 %v2601_v53, %v2441_v56  ;;  %v2436_v63 = vor.u32 %v2599_v61, %v2433_v62 }
 0x771   :  { %v1113_v2 = vmul.f32 0.7978846, %v1111_v0  ;;  %v1106_v4 = vmul.f32 %v1103_v1, %v1103_v1 }
 0x773   :  { %v1108_v5 = vmul.f32 %v1106_v4, %v1103_v1  ;;  %2740 = vtanh.f32 %v1113_v2 }
 0x775   :  { %v1110_v9 = vmul.f32 0.044715, %v1108_v5 }
 0x777   :  { %v1112_v11 = vadd.f32 %v1110_v9, %v1103_v1 }
 0x779   :  { %v1114_v12 = vmul.f32 0.7978846, %v1112_v11  ;;  %v2741_v13 = vpop.eup %2740 }
 0x77a   :  { %v1117_v14 = vadd.f32 1.0, %v2741_v13 }
 0x77b   :  { %2742 = vtanh.f32 %v1114_v12 }
 0x77c   :  { %v1119_v7 = vmul.f32 0.5, %v1117_v14 }
 0x77e   :  { %v1121_v18 = vmul.f32 %v1119_v7, %v1101_v59  ;;  %v2600_v59 = vld [vmem:[%s3696_s4 + $0x44] sm:$0xf0] }
 0x77f   :  { %v2432_v60 = vor.u32 %v2600_v59, %v2431_v58 }
 0x781   :  { %v2743_v15 = vpop.eup %2742 }
 0x782   :  { %v1118_v3 = vadd.f32 1.0, %v2743_v15 }
 0x784   :  { %v1120_v16 = vmul.f32 0.5, %v1118_v3 }
 0x786   :  { %v1122_v8 = vmul.f32 %v1120_v16, %v1103_v1 }
 0x788   :  { %v1123_v20 = vpack.c.bf16 %v1122_v8, %v1121_v18  ;;  %v2689_v8 = vld [vmem:[#allocation13] ss:$0 sm:$0xff] }
 0x78a   :  { %1200 = vmatmul.bf16.vlgmr.msrb.gmra.mxu2 %v1123_v20 }
 0x80d   :  { %v1201_v21 = vpop.f32.mrf.mxu2 }
 0x80e   :  { %v1202_v31 = vadd.f32 %v2688_v29, %v1201_v21 }
 0x810   :  { %v1206_v22 = vadd.f32 %v1202_v31, %v1049_v48  ;;  %v2448_v48 = vor.u32 %v2604_v46, %v2447_v45  ;;  %v2690_v31 = vld [vmem:[%s3707_s15] ss:$0 sm:$0xff] }
 0x812   :  { %v1210_v23 = vsel %vm164_vm0, %v1206_v22, 0.0  ;;  %1329 = vmatpush.bf16.msrb.mxu3 %v2448_v48 }
 0x813   :  { %1211 = vadd.xlane.f32.xlu1 %v1210_v23 }
 0x815   :  { %v1203_v24 = vpop.f32.mrf.mxu2 }
 0x816   :  { %v1204_v25 = vadd.f32 %v2688_v29, %v1203_v24  ;;  %1330 = vmatpush.bf16.msrb.mxu3 %v2440_v55 }
 0x818   :  { %v1207_v26 = vadd.f32 %v1204_v25, %v1050_v49  ;;  %v2449_v49 = vld [vmem:[%s3696_s4 + $0x68] sm:$0xf0] }
 0x819   :  { %v2452_v50 = vor.u32 %v2603_v47, %v2449_v49 }
 0x81a   :  { %v1213_v27 = vsel %vm164_vm0, %v1207_v26, 0.0  ;;  %1331 = vmatpush.bf16.msrb.mxu3 %v2432_v60 }
 0x81b   :  { %1214 = vadd.xlane.f32.xlu2 %v1213_v27  ;;  %1343 = vmatpush.bf16.msra.mxu0 %v2452_v50 }
 0x81f   :  { %1344 = vmatpush.bf16.msra.mxu0 %v2444_v19 }
 0x823   :  { %1345 = vmatpush.bf16.msra.mxu0 %v2436_v63 }
 0x886   :  { %v1212_v28 = vpop.xlane.xlu1 %1211 }
 0x887   :  { %v1216_v6 = vmul.f32 %v1212_v28, %v3141_v10  ;;  %v1275_v28 = vld [vmem:[#allocation10 + $0x2] sm:$0x3] }
 0x889   :  { %v3415_v30 = vsub.f32 %v1206_v22, %v1216_v6 }
 0x88b   :  { %v1220_v32 = vmul.f32 %v3415_v30, %v3415_v30 }
 0x88d   :  { %v1222_v33 = vsel %vm164_vm0, %v1220_v32, 0.0  ;;  %v1277_v32 = vperm.slane %v1275_v28, 0 }
 0x88e   :  { %v1215_v34 = vpop.xlane.xlu2 %1214  ;;  %1223 = vadd.xlane.f32.xlu0 %v1222_v33 }
 0x88f   :  { %v1217_v36 = vmul.f32 %v1215_v34, %v3141_v10 }
 0x891   :  { %v3421_v37 = vsub.f32 %v1207_v26, %v1217_v36 }
 0x893   :  { %v1221_v35 = vmul.f32 %v3421_v37, %v3421_v37 }
 0x895   :  { %v1225_v38 = vsel %vm164_vm0, %v1221_v35, 0.0 }
 0x896   :  { %1226 = vadd.xlane.f32.xlu1 %v1225_v38 }
 0x901   :  { %v1224_v51 = vpop.xlane.xlu0 %1223 }
 0x902   :  { %v1228_v54 = vmul.f32 %v1224_v51, %v3141_v10 }
 0x904   :  { %v1230_v57 = vadd.f32 1e-12, %v1228_v54 }
 0x906   :  { %2744 = vrsqrt.f32 %v1230_v57  ;;  %vm1238_vm1 = vweird.f32 %v1230_v57 }
 0x909   :  { %v1227_v0 = vpop.xlane.xlu1 %1226 }
 0x90a   :  { %v1229_v1 = vmul.f32 %v1227_v0, %v3141_v10 }
 0x90c   :  { %v2745_v2 = vpop.eup %2744  ;;  %v1231_v4 = vadd.f32 1e-12, %v1229_v1 }
 0x90d   :  { %v1233_v5 = vmul.f32 %v2745_v2, %v1230_v57  ;;  %vm1239_vm15 = vweird.f32 %v2745_v2 }
 0x90e   :  { %2746 = vrsqrt.f32 %v1231_v4  ;;  %vm1240_vm2 = vmor %vm1238_vm1, %vm1239_vm15  ;;  %vm1248_vm6 = vweird.f32 %v1231_v4 }
 0x90f   :  { %v1234_v9 = vmul.f32 %v2745_v2, %v1233_v5 }
 0x911   :  { %v1235_v11 = vmul.f32 0.5, %v1234_v9 }
 0x913   :  { %v1236_v12 = vsub.f32 1.5, %v1235_v11 }
 0x914   :  { %v2747_v13 = vpop.eup %2746 }
 0x915   :  { %v1237_v14 = vmul.f32 %v2745_v2, %v1236_v12  ;;  %v1243_v15 = vmul.f32 %v2747_v13, %v1231_v4  ;;  %vm1249_vm3 = vweird.f32 %v2747_v13 }
 0x916   :  { %vm1250_vm7 = vmor %vm1248_vm6, %vm1249_vm3 }
 0x917   :  { %v1244_v7 = vmul.f32 %v2747_v13, %v1243_v15  ;;  %v1241_v3 = vsel %vm1240_vm2, %v2745_v2, %v1237_v14 }
 0x918   :  { %v1252_v20 = vmul.f32 %v1241_v3, %v3415_v30  ;;  %v1278_v30 = vperm.slane %v1275_v28, 1 }
 0x919   :  { %v1245_v16 = vmul.f32 0.5, %v1244_v7 }
 0x91a   :  { %v1257_v22 = vmul.f32 %v2689_v8, %v1252_v20 }
 0x91b   :  { %v1246_v18 = vsub.f32 1.5, %v1245_v16 }
 0x91c   :  { %v3481_v25 = vadd.f32 %v2690_v31, %v1257_v22 }
 0x91d   :  { %v1247_v29 = vmul.f32 %v2747_v13, %v1246_v18 }
 0x91f   :  { %v1251_v21 = vsel %vm1250_vm7, %v2747_v13, %v1247_v29  ;;  %v2792_v29 = vld [vmem:[#allocation5 + $0x1] ss:$0 sm:$0xff] }
 0x920   :  { %v1253_v23 = vmul.f32 %v1251_v21, %v3421_v37 }
 0x922   :  { %v1258_v24 = vmul.f32 %v2689_v8, %v1253_v23 }
 0x924   :  { %v3483_v26 = vadd.f32 %v2690_v31, %v1258_v24 }
 0x926   :  { %v1264_v27 = vpack.c.bf16 %v3483_v26, %v3481_v25 }
 0x928   :  { %2461 = vmatmul.msk.bf16.vlgmr.msrb.gmra.mxu3 %vm164_vm0, %v1264_v27  ;;  %2462 = vmatmul.msk.bf16.vlgmr.msra.gmra.mxu0 %vm164_vm0, %v1264_v27 }
 0x9a5   :  { %v1347_v6 = vpop.f32.mrf.mxu0 }
 0x9a6   :  { %v1348_v34 = vadd.f32 %v1347_v6, %v1278_v30 }
 0x9ab   :  { %v1333_v33 = vpop.f32.mrf.mxu3 }
 0x9ac   :  { %v1334_v36 = vadd.f32 %v1333_v33, %v1277_v32 }
 0x9ad   :  { %v1349_v35 = vpop.f32.mrf.mxu0 }
 0x9ae   :  { %v1352_v37 = vpack.c.bf16 %v1348_v34, %v1334_v36  ;;  %v1350_v39 = vadd.f32 %v1349_v35, %v1278_v30 }
 0x9b0   :  { %1360 = vrot.lane.b32.xlu1 %v1352_v37, %s3020_s2  ;;  %1356 = vrot.lane.b32.xlu2 %v1352_v37, %s3019_s26  ;;  %v1376_v44 = vunpack.c.l.b16 %v1352_v37  ;;  %v1368_v2 = vrot.slane %v1352_v37, 4 }
 0x9b2   :  { %v1377_v45 = vpack.c.b16 %v1376_v44, %v1376_v44  ;;  %v1764_v12 = vsel %vm757_vm9, %v1368_v2, 0  ;;  %v2798_v2 = vld [vmem:[#allocation5 + $0x5] ss:$0 sm:$0xff] }
 0x9b3   :  { %v1335_v38 = vpop.f32.mrf.mxu3 }
 0x9b4   :  { %v1336_v40 = vadd.f32 %v1335_v38, %v1277_v32 }
 0x9b6   :  { %v3491_v41 = vpack.c.bf16 %v1350_v39, %v1336_v40 }
 0x9b8   :  { %1358 = vrot.lane.b32.xlu0 %v3491_v41, %s3019_s26  ;;  %1366 = vrot.lane.b32.xlu1 %v3491_v41, %s3018_s23  ;;  %v1399_v42 = vunpack.c.l.b16 %v3491_v41  ;;  %v1369_v31 = vrot.slane %v3491_v41, 4 }
 0x9b9   :  { %1364 = vrot.lane.b32.xlu2 %v1352_v37, %s3018_s23 }
 0x9ba   :  { %v1400_v43 = vpack.c.b16 %v1399_v42, %v1399_v42  ;;  %v1783_v30 = vsel %vm757_vm9, %v1369_v31, 0 }
 0x9c0   :  { %1362 = vrot.lane.b32.xlu0 %v3491_v41, %s3020_s2 }
 0x9c1   :  { %1401 = vrot.lane.b32.xlu2 %v1400_v43, %s3007_s27 }
 0x9c8   :  { %1378 = vrot.lane.b32.xlu0 %v1377_v45, %s3007_s27 }
 0xa0a   :  { %v3503_v46 = vpop.permute.xlu2 %1356 }
 0xa0b   :  { %v1422_v47 = vunpack.c.l.b16 %v3503_v46  ;;  %v1370_v20 = vrot.slane %v3503_v46, 4 }
 0xa0d   :  { %v1423_v48 = vpack.c.b16 %v1422_v47, %v1422_v47  ;;  %v1802_v32 = vsel %vm757_vm9, %v1370_v20, 0 }
 0xa0f   :  { %1424 = vrot.lane.b32.xlu1 %v1423_v48, %s3007_s27 }
 0xa13   :  { %v3507_v49 = vpop.permute.xlu2 %1364 }
 0xa14   :  { %v1514_v59 = vunpack.c.l.b16 %v3507_v49  ;;  %v1374_v34 = vrot.slane %v3507_v49, 4 }
 0xa16   :  { %v1515_v63 = vpack.c.b16 %v1514_v59, %v1514_v59  ;;  %v1878_v35 = vsel %vm757_vm9, %v1374_v34, 0 }
 0xa1b   :  { %v1402_v50 = vpop.permute.xlu2 %1401 }
 0xa1c   :  { %v1407_v51 = vsel %vm372_vm8, %v1402_v50, 0  ;;  %v2795_v50 = vld [vmem:[#allocation5 + $0x4] ss:$0 sm:$0xff] }
 0xa1d   :  { %1416 = vmatpush.bf16.xpose.msra.mxu3 %v1407_v51 }
 0xa22   :  { %v1361_v52 = vpop.permute.xlu1 %1360 }
 0xa23   :  { %v1468_v17 = vunpack.c.l.b16 %v1361_v52  ;;  %v1372_v13 = vrot.slane %v1361_v52, 4 }
 0xa24   :  { %2464 = vmatmul.msk.bf16.vlgmr.msra.gmra.mxu3 %vm372_vm8, %v3491_v41  ;;  %v2793_v41 = vld [vmem:[#allocation5] ss:$0 sm:$0xff] }
 0xa25   :  { %v1469_v53 = vpack.c.b16 %v1468_v17, %v1468_v17  ;;  %v1840_v14 = vsel %vm757_vm9, %v1372_v13, 0 }
 0xa27   :  { %1470 = vrot.lane.b32.xlu2 %v1469_v53, %s3007_s27 }
 0xa2a   :  { %v1359_v54 = vpop.permute.xlu0 %1358  ;;  %v3513_v55 = vpop.permute.xlu1 %1366 }
 0xa2b   :  { %v1537_v56 = vunpack.c.l.b16 %v3513_v55  ;;  %v1445_v19 = vunpack.c.l.b16 %v1359_v54  ;;  %v1371_v18 = vrot.slane %v1359_v54, 4  ;;  %v1375_v38 = vrot.slane %v3513_v55, 4 }
 0xa2d   :  { %v1538_v57 = vpack.c.b16 %v1537_v56, %v1537_v56  ;;  %v1446_v58 = vpack.c.b16 %v1445_v19, %v1445_v19  ;;  %v1821_v6 = vsel %vm757_vm9, %v1371_v18, 0  ;;  %v1897_v39 = vsel %vm757_vm9, %v1375_v38, 0  ;;  %v2796_v56 = vld [vmem:[#allocation5 + $0x3] ss:$0 sm:$0xff] }
 0xa2f   :  { %1539 = vrot.lane.b32.xlu2 %v1538_v57, %s3007_s27  ;;  %1447 = vrot.lane.b32.xlu0 %v1446_v58, %s3007_s27 }
 0xa32   :  { %v1363_v60 = vpop.permute.xlu0 %1362 }
 0xa33   :  { %v1491_v61 = vunpack.c.l.b16 %v1363_v60  ;;  %v1373_v33 = vrot.slane %v1363_v60, 4 }
 0xa35   :  { %v1492_v62 = vpack.c.b16 %v1491_v61, %v1491_v61 }
 0xa37   :  { %1493 = vrot.lane.b32.xlu1 %v1492_v62, %s3007_s27  ;;  %1516 = vrot.lane.b32.xlu0 %v1515_v63, %s3007_s27  ;;  %v2797_v62 = vld [vmem:[#allocation5 + $0x6] ss:$0 sm:$0xff] }
 0xa3a   :  { %v1379_v0 = vpop.permute.xlu0 %1378 }
 0xa3b   :  { %v1384_v1 = vsel %vm372_vm8, %v1379_v0, 0 }
 0xa3c   :  { %1393 = vmatpush.bf16.xpose.msra.mxu1 %v1384_v1 }
 0xa43   :  { %2463 = vmatmul.msk.bf16.vlgmr.msra.gmra.mxu1 %vm372_vm8, %v1352_v37  ;;  %v1859_v37 = vsel %vm757_vm9, %v1373_v33, 0 }
 0xa81   :  { %v1425_v4 = vpop.permute.xlu1 %1424  ;;  %v1471_v5 = vpop.permute.xlu2 %1470 }
 0xa82   :  { %v1430_v9 = vsel %vm372_vm8, %v1425_v4, 0  ;;  %v1476_v11 = vsel %vm372_vm8, %v1471_v5, 0 }
 0xa83   :  { %1439 = vmatpush.bf16.xpose.msrb.mxu0 %v1430_v9  ;;  %1485 = vmatpush.bf16.xpose.msra.mxu2 %v1476_v11 }
 0xa89   :  { %v1540_v15 = vpop.permute.xlu2 %1539 }
 0xa8a   :  { %2465 = vmatmul.msk.bf16.vlgmr.msrb.gmra.mxu0 %vm372_vm8, %v3503_v46  ;;  %2467 = vmatmul.msk.bf16.vlgmr.msra.gmra.mxu2 %vm372_vm8, %v1361_v52  ;;  %v1545_v16 = vsel %vm372_vm8, %v1540_v15, 0  ;;  %v2794_v46 = vld [vmem:[#allocation5 + $0x2] ss:$0 sm:$0xff] }
 0xa8b   :  { %1773 = vmatpush.bf16.msrb.mxu2 %v1764_v12 }
 0xa8f   :  { %1849 = vmatpush.bf16.msra.mxu2 %v1840_v14  ;;  %v2799_v14 = vld [vmem:[#allocation5 + $0x7] ss:$0 sm:$0xff] }
 0xaa1   :  { %v1448_v7 = vpop.permute.xlu0 %1447 }
 0xaa2   :  { %v1453_v3 = vsel %vm372_vm8, %v1448_v7, 0 }
 0xaa3   :  { %1462 = vmatpush.bf16.xpose.msrb.mxu1 %v1453_v3 }
 0xaa7   :  { %v1418_v8 = vpop.f32.mrf.mxu3 }
 0xaa8   :  { %v1419_v21 = vadd.f32 %v2792_v29, %v1418_v8 }
 0xaa9   :  { %v1494_v22 = vpop.permute.xlu1 %1493  ;;  %v1517_v23 = vpop.permute.xlu0 %1516 }
 0xaaa   :  { %v1499_v24 = vsel %vm372_vm8, %v1494_v22, 0  ;;  %v1522_v27 = vsel %vm372_vm8, %v1517_v23, 0  ;;  %v1563_v28 = vsel %vm553_vm10, %v1419_v21, -inf  ;;  %2466 = vmatmul.msk.bf16.vlgmr.msrb.gmra.mxu1 %vm372_vm8, %v1359_v54 }
 0xaab   :  { %1554 = vmatpush.bf16.xpose.msra.mxu1 %v1545_v16  ;;  %1564 = vmax.xlane.f32.xlu0 %v1563_v28 }
 0xaac   :  { %1508 = vmatpush.bf16.xpose.msrb.mxu3 %v1499_v24  ;;  %1531 = vmatpush.bf16.xpose.msra.mxu0 %v1522_v27 }
 0xaaf   :  { %v1420_v36 = vpop.f32.mrf.mxu3 }
 0xab3   :  { %1830 = vmatpush.bf16.msrb.mxu1 %v1821_v6  ;;  %2468 = vmatmul.msk.bf16.vlgmr.msrb.gmra.mxu3 %vm372_vm8, %v1363_v60 }
 0xab4   :  { %1792 = vmatpush.bf16.msra.mxu3 %v1783_v30  ;;  %1811 = vmatpush.bf16.msrb.mxu0 %v1802_v32 }
 0xab5   :  { %2469 = vmatmul.msk.bf16.vlgmr.msra.gmra.mxu0 %vm372_vm8, %v3507_v49 }
 0xab8   :  { %1868 = vmatpush.bf16.msrb.mxu3 %v1859_v37  ;;  %1887 = vmatpush.bf16.msra.mxu0 %v1878_v35 }
 0xaba   :  { %2470 = vmatmul.msk.bf16.vlgmr.msra.gmra.mxu1 %vm372_vm8, %v3513_v55 }
 0xabb   :  { %1906 = vmatpush.bf16.msra.mxu1 %v1897_v39 }
 0xac0   :  { %v1395_v40 = vpop.f32.mrf.mxu1 }
 0xac1   :  { %v1396_v42 = vadd.f32 %v2793_v41, %v1395_v40 }
 0xac3   :  { %v1560_v43 = vsel %vm553_vm10, %v1396_v42, -inf }
 0xac4   :  { %1561 = vmax.xlane.f32.xlu1 %v1560_v43 }
 0xac8   :  { %v1397_v44 = vpop.f32.mrf.mxu1 }
 0xb07   :  { %v1441_v45 = vpop.f32.mrf.mxu0 }
 0xb08   :  { %v1442_v47 = vadd.f32 %v2794_v46, %v1441_v45 }
 0xb0a   :  { %v1566_v48 = vsel %vm553_vm10, %v1442_v47, -inf }
 0xb0b   :  { %1567 = vmax.xlane.f32.xlu2 %v1566_v48 }
 0xb0d   :  { %v1487_v49 = vpop.f32.mrf.mxu2 }
 0xb0e   :  { %v1488_v51 = vadd.f32 %v2795_v50, %v1487_v49 }
 0xb0f   :  { %v1443_v52 = vpop.f32.mrf.mxu0 }
 0xb10   :  { %v1572_v17 = vsel %vm553_vm10, %v1488_v51, -inf }
 0xb11   :  { %1573 = vmax.xlane.f32.xlu0 %v1572_v17 }
 0xb15   :  { %v1489_v53 = vpop.f32.mrf.mxu2 }
 0xb1e   :  { %v1565_v54 = vpop.xlane.xlu0 %1564 }
 0xb1f   :  { %v1585_v57 = vsub.f32 %v1419_v21, %v1565_v54 }
 0xb21   :  { %v1594_v59 = vmul.f32 1.442695, %v1585_v57 }
 0xb23   :  { %2748 = vpow2.f32 %v1594_v59 }
 0xb27   :  { %v1464_v55 = vpop.f32.mrf.mxu1 }
 0xb28   :  { %v1465_v19 = vadd.f32 %v2796_v56, %v1464_v55 }
 0xb29   :  { %v3556_v11 = vpop.eup %2748 }
 0xb2a   :  { %v1569_v58 = vsel %vm553_vm10, %v1465_v19, -inf  ;;  %v1611_v18 = vsel %vm553_vm10, %v3556_v11, 0.0 }
 0xb2b   :  { %1570 = vmax.xlane.f32.xlu1 %v1569_v58 }
 0xb2f   :  { %v1466_v60 = vpop.f32.mrf.mxu1 }
 0xb32   :  { %v1533_v61 = vpop.f32.mrf.mxu0 }
 0xb33   :  { %v1534_v63 = vadd.f32 %v2797_v62, %v1533_v61 }
 0xb35   :  { %v1578_v0 = vsel %vm553_vm10, %v1534_v63, -inf }
 0xb36   :  { %1579 = vmax.xlane.f32.xlu1 %v1578_v0  ;;  %v1510_v1 = vpop.f32.mrf.mxu3 }
 0xb37   :  { %v1511_v4 = vadd.f32 %v2798_v2, %v1510_v1  ;;  %v1562_v5 = vpop.xlane.xlu1 %1561  ;;  %v1556_v9 = vpop.f32.mrf.mxu1 }
 0xb38   :  { %v1584_v12 = vsub.f32 %v1396_v42, %v1562_v5  ;;  %v1557_v15 = vadd.f32 %v2799_v14, %v1556_v9 }
 0xb39   :  { %v1575_v7 = vsel %vm553_vm10, %v1511_v4, -inf }
 0xb3a   :  { %v1535_v13 = vpop.f32.mrf.mxu0  ;;  %1576 = vmax.xlane.f32.xlu2 %v1575_v7  ;;  %v1592_v3 = vmul.f32 1.442695, %v1584_v12  ;;  %v1581_v16 = vsel %vm553_vm10, %v1557_v15, -inf }
 0xb3b   :  { %1582 = vmax.xlane.f32.xlu0 %v1581_v16 }
 0xb3c   :  { %2750 = vpow2.f32 %v1592_v3 }
 0xb3e   :  { %1612 = vadd.xlane.f32.xlu1 %v1611_v18  ;;  %v1512_v8 = vpop.f32.mrf.mxu3 }
 0xb3f   :  { %v1558_v20 = vpop.f32.mrf.mxu1 }
 0xb42   :  { %v3562_v29 = vpop.eup %2750 }
 0xb43   :  { %v1608_v21 = vsel %vm553_vm10, %v3562_v29, 0.0 }
 0xb44   :  { %1609 = vadd.xlane.f32.xlu2 %v1608_v21 }
 0xb7e   :  { %v1568_v31 = vpop.xlane.xlu2 %1567 }
 0xb7f   :  { %v1586_v22 = vsub.f32 %v1442_v47, %v1568_v31 }
 0xb81   :  { %v1596_v23 = vmul.f32 1.442695, %v1586_v22 }
 0xb83   :  { %2752 = vpow2.f32 %v1596_v23 }
 0xb84   :  { %v1574_v24 = vpop.xlane.xlu0 %1573 }
 0xb85   :  { %v1588_v27 = vsub.f32 %v1488_v51, %v1574_v24 }
 0xb87   :  { %v1600_v28 = vmul.f32 1.442695, %v1588_v27 }
 0xb89   :  { %v3566_v6 = vpop.eup %2752  ;;  %2754 = vpow2.f32 %v1600_v28 }
 0xb8a   :  { %v1614_v30 = vsel %vm553_vm10, %v3566_v6, 0.0 }
 0xb8b   :  { %1615 = vadd.xlane.f32.xlu0 %v1614_v30 }
 0xb8f   :  { %v3570_v32 = vpop.eup %2754 }
 0xb90   :  { %v1620_v33 = vsel %vm553_vm10, %v3570_v32, 0.0 }
 0xb91   :  { %1621 = vadd.xlane.f32.xlu1 %v1620_v33 }
 0xb9e   :  { %v1571_v34 = vpop.xlane.xlu1 %1570 }
 0xb9f   :  { %v1587_v36 = vsub.f32 %v1465_v19, %v1571_v34 }
 0xba1   :  { %v1598_v37 = vmul.f32 1.442695, %v1587_v36 }
 0xba3   :  { %2756 = vpow2.f32 %v1598_v37 }
 0xba9   :  { %v1580_v35 = vpop.xlane.xlu1 %1579  ;;  %v3574_v39 = vpop.eup %2756 }
 0xbaa   :  { %v1590_v38 = vsub.f32 %v1534_v63, %v1580_v35  ;;  %v1617_v41 = vsel %vm553_vm10, %v3574_v39, 0.0 }
 0xbab   :  { %1618 = vadd.xlane.f32.xlu2 %v1617_v41 }
 0xbac   :  { %v1604_v40 = vmul.f32 1.442695, %v1590_v38 }
 0xbad   :  { %v1577_v42 = vpop.xlane.xlu2 %1576 }
 0xbae   :  { %2758 = vpow2.f32 %v1604_v40  ;;  %v1589_v43 = vsub.f32 %v1511_v4, %v1577_v42  ;;  %v1583_v44 = vpop.xlane.xlu0 %1582 }
 0xbaf   :  { %v1591_v47 = vsub.f32 %v1557_v15, %v1583_v44 }
 0xbb0   :  { %v1602_v45 = vmul.f32 1.442695, %v1589_v43 }
 0xbb1   :  { %v1613_v46 = vpop.xlane.xlu1 %1612  ;;  %v1606_v48 = vmul.f32 1.442695, %v1591_v47 }
 0xbb2   :  { %2760 = vrcp.f32 %v1613_v46  ;;  %v1658_v19 = vand.u32 2147483648, %v1613_v46  ;;  %v1656_v59 = vand.u32 2147483647, %v1613_v46  ;;  %vm1652_vm11 = vweird.f32 %v1613_v46 }
 0xbb3   :  { %2762 = vpow2.f32 %v1602_v45 }
 0xbb4   :  { %v3578_v49 = vpop.eup %2758  ;;  %2764 = vpow2.f32 %v1606_v48  ;;  %v1659_v62 = vor.u32 1.1754944e-38, %v1658_v19  ;;  %vm1657_vm13 = vcmp.eq.f32.partialorder %v1656_v59, 8.507059e+37 }
 0xbb5   :  { %v1626_v50 = vsel %vm553_vm10, %v3578_v49, 0.0 }
 0xbb6   :  { %1627 = vadd.xlane.f32.xlu2 %v1626_v50 }
 0xbb7   :  { %v1610_v53 = vpop.xlane.xlu2 %1609 }
 0xbb8   :  { %v2761_v51 = vpop.eup %2760  ;;  %2766 = vrcp.f32 %v1610_v53  ;;  %v1643_v5 = vand.u32 2147483648, %v1610_v53  ;;  %v1641_v12 = vand.u32 2147483647, %v1610_v53  ;;  %vm1637_vm15 = vweird.f32 %v1610_v53 }
 0xbb9   :  { %v3582_v52 = vpop.eup %2762  ;;  %v1648_v17 = vmul.f32 %v2761_v51, %v1613_v46  ;;  %vm1653_vm9 = vweird.f32 %v2761_v51 }
 0xbba   :  { %v3584_v54 = vpop.eup %2764  ;;  %v1623_v56 = vsel %vm553_vm10, %v3582_v52, 0.0  ;;  %vm1654_vm12 = vmor %vm1652_vm11, %vm1653_vm9  ;;  %v1644_v15 = vor.u32 1.1754944e-38, %v1643_v5  ;;  %vm1642_vm2 = vcmp.eq.f32.partialorder %v1641_v12, 8.507059e+37 }
 0xbbb   :  { %v1649_v55 = vsub.f32 1.0, %v1648_v17  ;;  %1624 = vadd.xlane.f32.xlu0 %v1623_v56  ;;  %v1629_v57 = vsel %vm553_vm10, %v3584_v54, 0.0 }
 0xbbc   :  { %1630 = vadd.xlane.f32.xlu1 %v1629_v57 }
 0xbbd   :  { %v1650_v58 = vmul.f32 %v2761_v51, %v1649_v55 }
 0xbbe   :  { %v2767_v61 = vpop.eup %2766 }
 0xbbf   :  { %v1651_v60 = vadd.f32 %v2761_v51, %v1650_v58  ;;  %v1633_v0 = vmul.f32 %v2767_v61, %v1610_v53  ;;  %vm1638_vm14 = vweird.f32 %v2767_v61 }
 0xbc0   :  { %vm1639_vm1 = vmor %vm1637_vm15, %vm1638_vm14 }
 0xbc1   :  { %v1655_v63 = vsel %vm1654_vm12, %v2761_v51, %v1651_v60  ;;  %v1634_v4 = vsub.f32 1.0, %v1633_v0 }
 0xbc2   :  { %v1660_v1 = vsel %vm1657_vm13, %v1659_v62, %v1655_v63 }
 0xbc3   :  { %v1661_v2 = vmul.f32 %v3556_v11, %v1660_v1  ;;  %v1635_v9 = vmul.f32 %v2767_v61, %v1634_v4 }
 0xbc5   :  { %v1753_v13 = vpack.c.bf16 %v1661_v2, %v1661_v2  ;;  %v1636_v14 = vadd.f32 %v2767_v61, %v1635_v9 }
 0xbc7   :  { %2472 = vmatmul.msk.bf16.vlgmr.msra.gmra.mxu3 %vm553_vm10, %v1753_v13  ;;  %v1640_v7 = vsel %vm1639_vm1, %v2767_v61, %v1636_v14 }
 0xbc8   :  { %v1645_v3 = vsel %vm1642_vm2, %v1644_v15, %v1640_v7 }
 0xbc9   :  { %v1646_v16 = vmul.f32 %v3562_v29, %v1645_v3 }
 0xbcb   :  { %v1752_v18 = vpack.c.bf16 %v1646_v16, %v1646_v16 }
 0xbcd   :  { %2471 = vmatmul.msk.bf16.vlgmr.msrb.gmra.mxu2 %vm553_vm10, %v1752_v18 }
 0xbfe   :  { %v1616_v11 = vpop.xlane.xlu0 %1615 }
 0xbff   :  { %2768 = vrcp.f32 %v1616_v11  ;;  %v1673_v22 = vand.u32 2147483648, %v1616_v11  ;;  %v1671_v24 = vand.u32 2147483647, %v1616_v11  ;;  %vm1667_vm6 = vweird.f32 %v1616_v11 }
 0xc01   :  { %v1674_v29 = vor.u32 1.1754944e-38, %v1673_v22  ;;  %vm1672_vm9 = vcmp.eq.f32.partialorder %v1671_v24, 8.507059e+37 }
 0xc04   :  { %v1622_v8 = vpop.xlane.xlu1 %1621 }
 0xc05   :  { %v2769_v20 = vpop.eup %2768  ;;  %2770 = vrcp.f32 %v1622_v8  ;;  %v1703_v37 = vand.u32 2147483648, %v1622_v8  ;;  %v1701_v40 = vand.u32 2147483647, %v1622_v8  ;;  %vm1697_vm12 = vweird.f32 %v1622_v8 }
 0xc06   :  { %v1663_v21 = vmul.f32 %v2769_v20, %v1616_v11  ;;  %vm1668_vm3 = vweird.f32 %v2769_v20 }
 0xc07   :  { %vm1669_vm7 = vmor %vm1667_vm6, %vm1668_vm3  ;;  %v1704_v43 = vor.u32 1.1754944e-38, %v1703_v37  ;;  %vm1702_vm14 = vcmp.eq.f32.partialorder %v1701_v40, 8.507059e+37 }
 0xc08   :  { %v1664_v31 = vsub.f32 1.0, %v1663_v21 }
 0xc0a   :  { %v1665_v23 = vmul.f32 %v2769_v20, %v1664_v31 }
 0xc0b   :  { %v2771_v27 = vpop.eup %2770 }
 0xc0c   :  { %v1666_v28 = vadd.f32 %v2769_v20, %v1665_v23  ;;  %v1693_v30 = vmul.f32 %v2771_v27, %v1622_v8  ;;  %vm1698_vm11 = vweird.f32 %v2771_v27 }
 0xc0d   :  { %vm1699_vm13 = vmor %vm1697_vm12, %vm1698_vm11 }
 0xc0e   :  { %v1670_v33 = vsel %vm1669_vm7, %v2769_v20, %v1666_v28  ;;  %v1694_v34 = vsub.f32 1.0, %v1693_v30 }
 0xc0f   :  { %v1675_v36 = vsel %vm1672_vm9, %v1674_v29, %v1670_v33 }
 0xc10   :  { %v1676_v35 = vmul.f32 %v3566_v6, %v1675_v36  ;;  %v1695_v38 = vmul.f32 %v2771_v27, %v1694_v34 }
 0xc12   :  { %v1696_v41 = vadd.f32 %v2771_v27, %v1695_v38  ;;  %v1754_v42 = vpack.c.bf16 %v1676_v35, %v1676_v35 }
 0xc14   :  { %v1700_v44 = vsel %vm1699_vm13, %v2771_v27, %v1696_v41  ;;  %2473 = vmatmul.msk.bf16.vlgmr.msrb.gmra.mxu0 %vm553_vm10, %v1754_v42 }
 0xc15   :  { %v1705_v45 = vsel %vm1702_vm14, %v1704_v43, %v1700_v44 }
 0xc16   :  { %v1706_v46 = vmul.f32 %v3570_v32, %v1705_v45 }
 0xc18   :  { %v1756_v47 = vpack.c.bf16 %v1706_v46, %v1706_v46 }
 0xc1a   :  { %2475 = vmatmul.msk.bf16.vlgmr.msra.gmra.mxu2 %vm553_vm10, %v1756_v47 }
 0xc1e   :  { %v1619_v48 = vpop.xlane.xlu2 %1618 }
 0xc1f   :  { %2772 = vrcp.f32 %v1619_v48  ;;  %v1688_v53 = vand.u32 2147483648, %v1619_v48  ;;  %v1686_v56 = vand.u32 2147483647, %v1619_v48  ;;  %vm1682_vm1 = vweird.f32 %v1619_v48 }
 0xc21   :  { %v1689_v57 = vor.u32 1.1754944e-38, %v1688_v53  ;;  %vm1687_vm3 = vcmp.eq.f32.partialorder %v1686_v56, 8.507059e+37 }
 0xc25   :  { %v2773_v6 = vpop.eup %2772 }
 0xc26   :  { %v1678_v50 = vmul.f32 %v2773_v6, %v1619_v48  ;;  %vm1683_vm15 = vweird.f32 %v2773_v6 }
 0xc27   :  { %vm1684_vm2 = vmor %vm1682_vm1, %vm1683_vm15 }
 0xc28   :  { %v1679_v17 = vsub.f32 1.0, %v1678_v50 }
 0xc29   :  { %v1628_v51 = vpop.xlane.xlu2 %1627 }
 0xc2a   :  { %2774 = vrcp.f32 %v1628_v51  ;;  %v1680_v55 = vmul.f32 %v2773_v6, %v1679_v17  ;;  %v1733_v1 = vand.u32 2147483648, %v1628_v51  ;;  %v1731_v5 = vand.u32 2147483647, %v1628_v51 }
 0xc2b   :  { %vm1727_vm7 = vweird.f32 %v1628_v51 }
 0xc2c   :  { %v1681_v19 = vadd.f32 %v2773_v6, %v1680_v55  ;;  %v1734_v15 = vor.u32 1.1754944e-38, %v1733_v1  ;;  %vm1732_vm11 = vcmp.eq.f32.partialorder %v1731_v5, 8.507059e+37 }
 0xc2e   :  { %v1625_v58 = vpop.xlane.xlu0 %1624  ;;  %v1685_v59 = vsel %vm1684_vm2, %v2773_v6, %v1681_v19 }
 0xc2f   :  { %2776 = vrcp.f32 %v1625_v58  ;;  %v1631_v60 = vpop.xlane.xlu1 %1630  ;;  %v1690_v61 = vsel %vm1687_vm3, %v1689_v57, %v1685_v59  ;;  %v1716_v18 = vand.u32 2147483647, %v1625_v58  ;;  %v1718_v11 = vand.u32 2147483648, %v1625_v58  ;;  %v2608_v59 = vld [vmem:[%s3698_s6 + $0x28] sm:$0xff] }
 0xc30   :  { %v2775_v32 = vpop.eup %2774  ;;  %v1691_v63 = vmul.f32 %v3574_v39, %v1690_v61  ;;  %2778 = vrcp.f32 %v1631_v60  ;;  %vm1712_vm13 = vweird.f32 %v1625_v58  ;;  %v1746_v31 = vand.u32 2147483647, %v1631_v60 }
 0xc31   :  { %v1723_v62 = vmul.f32 %v2775_v32, %v1628_v51  ;;  %vm1728_vm6 = vweird.f32 %v2775_v32  ;;  %v1748_v22 = vand.u32 2147483648, %v1631_v60  ;;  %v1719_v28 = vor.u32 1.1754944e-38, %v1718_v11 }
 0xc32   :  { %v1755_v2 = vpack.c.bf16 %v1691_v63, %v1691_v63  ;;  %vm1729_vm9 = vmor %vm1727_vm7, %vm1728_vm6  ;;  %vm1717_vm1 = vcmp.eq.f32.partialorder %v1716_v18, 8.507059e+37  ;;  %vm1742_vm2 = vweird.f32 %v1631_v60  ;;  %vm1747_vm6 = vcmp.eq.f32.partialorder %v1746_v31, 8.507059e+37 }
 0xc33   :  { %v1724_v0 = vsub.f32 1.0, %v1723_v62 }
 0xc34   :  { %2474 = vmatmul.msk.bf16.vlgmr.msrb.gmra.mxu1 %vm553_vm10, %v1755_v2 }
 0xc35   :  { %v1725_v4 = vmul.f32 %v2775_v32, %v1724_v0  ;;  %v2777_v9 = vpop.eup %2776 }
 0xc36   :  { %v1708_v13 = vmul.f32 %v2777_v9, %v1625_v58  ;;  %v2779_v14 = vpop.eup %2778  ;;  %vm1713_vm12 = vweird.f32 %v2777_v9  ;;  %v2610_v58 = vld [vmem:[%s3698_s6 + $0x38] sm:$0xff] }
 0xc37   :  { %v1726_v12 = vadd.f32 %v2775_v32, %v1725_v4  ;;  %v1738_v39 = vmul.f32 %v2779_v14, %v1631_v60  ;;  %vm1743_vm14 = vweird.f32 %v2779_v14  ;;  %vm1714_vm15 = vmor %vm1712_vm13, %vm1713_vm12  ;;  %1988 = vmatpush.bf16.msrb.mxu2 %v2610_v58  ;;  %v2607_v60 = vld [vmem:[%s3698_s6 + $0x20] sm:$0xff] }
 0xc38   :  { %v1709_v3 = vsub.f32 1.0, %v1708_v13  ;;  %vm1744_vm3 = vmor %vm1742_vm2, %vm1743_vm14  ;;  %vm2283_vm2 = vcmask 517120  }
 0xc39   :  { %v1730_v7 = vsel %vm1729_vm9, %v2775_v32, %v1726_v12  ;;  %v1739_v21 = vsub.f32 1.0, %v1738_v39  ;;  %v2609_v32 = vld [vmem:[%s3698_s6 + $0x30] sm:$0xff] }
 0xc3a   :  { %v1735_v16 = vsel %vm1732_vm11, %v1734_v15, %v1730_v7  ;;  %v1710_v20 = vmul.f32 %v2777_v9, %v1709_v3 }
 0xc3b   :  { %v1736_v8 = vmul.f32 %v3578_v49, %v1735_v16  ;;  %v1740_v24 = vmul.f32 %v2779_v14, %v1739_v21  ;;  %v1749_v49 = vor.u32 1.1754944e-38, %v1748_v22  ;;  %1989 = vmatpush.bf16.msrb.mxu2 %v2609_v32  ;;  %v2691_v16 = vld [vmem:[%s3699_s7 + $0x1] ss:$0 sm:$0xff]  ;;  %s3712_s7 = sld [smem:[#allocation21_spill]] }
 0xc3c   :  { %v1711_v23 = vadd.f32 %v2777_v9, %v1710_v20 }
 0xc3d   :  { %v1758_v27 = vpack.c.bf16 %v1736_v8, %v1736_v8  ;;  %v1741_v29 = vadd.f32 %v2779_v14, %v1740_v24 }
 0xc3e   :  { %v1715_v30 = vsel %vm1714_vm15, %v2777_v9, %v1711_v23 }
 0xc3f   :  { %2477 = vmatmul.msk.bf16.vlgmr.msra.gmra.mxu0 %vm553_vm10, %v1758_v27  ;;  %v1720_v33 = vsel %vm1717_vm1, %v1719_v28, %v1715_v30  ;;  %v1745_v36 = vsel %vm1744_vm3, %v2779_v14, %v1741_v29  ;;  %1990 = vmatpush.bf16.msrb.mxu2 %v2608_v59  ;;  %v2693_v59 = vld [vmem:[%s3701_s9 + $0x1] ss:$0 sm:$0xff]  ;;  %vm2280_vm1 = vcmask 1041409  }
 0xc40   :  { %v1721_v34 = vmul.f32 %v3582_v52, %v1720_v33  ;;  %v1750_v37 = vsel %vm1747_vm6, %v1749_v49, %v1745_v36 }
 0xc41   :  { %v1751_v35 = vmul.f32 %v3584_v54, %v1750_v37  ;;  %v2613_v37 = vld [vmem:[#allocation11 + $0x30] sm:$0xff]  ;;  %s2292_s20 = sshll.u32 %s3712_s7, 4  ;;  %s2293_s20 = int_to_ptr.hbm [resolvable:$true] %s2292_s20 }
 0xc42   :  { %v1757_v38 = vpack.c.bf16 %v1721_v34, %v1721_v34 }
 0xc43   :  { %v1759_v40 = vpack.c.bf16 %v1751_v35, %v1751_v35  ;;  %1991 = vmatpush.bf16.msrb.mxu2 %v2607_v60 }
 0xc44   :  { %2476 = vmatmul.msk.bf16.vlgmr.msrb.gmra.mxu3 %vm553_vm10, %v1757_v38  ;;  %v2612_v38 = vld [vmem:[#allocation11 + $0x28] sm:$0xff] }
 0xc45   :  { %2478 = vmatmul.msk.bf16.vlgmr.msra.gmra.mxu1 %vm553_vm10, %v1759_v40 }
 0xc4a   :  { %v1794_v41 = vpop.f32.mrf.mxu3 }
 0xc50   :  { %v1775_v43 = vpop.f32.mrf.mxu2 }
 0xc52   :  { %v1796_v42 = vpop.f32.mrf.mxu3 }
 0xc53   :  { %v2611_v42 = vld [vmem:[#allocation11 + $0x20] sm:$0xff] }
 0xc58   :  { %v1777_v44 = vpop.f32.mrf.mxu2 }
 0xc91   :  { %v1813_v45 = vpop.f32.mrf.mxu0 }
 0xc99   :  { %v1815_v46 = vpop.f32.mrf.mxu0 }
 0xc9d   :  { %v1851_v47 = vpop.f32.mrf.mxu2 }
 0xca5   :  { %v1853_v48 = vpop.f32.mrf.mxu2 }
 0xcb1   :  { %v1832_v52 = vpop.f32.mrf.mxu1 }
 0xcb2   :  { %v2659_v6 = vpack.i.bf16 %v1832_v52, %v1813_v45 }
 0xcb4   :  { %2660 = vrot.lane.b32.xlu0 %v2659_v6, %s3003_s29 }
 0xcb9   :  { %v1834_v50 = vpop.f32.mrf.mxu1 }
 0xcbc   :  { %v1889_v54 = vpop.f32.mrf.mxu0 }
 0xcc2   :  { %v1908_v17 = vpop.f32.mrf.mxu1 }
 0xcc3   :  { %v2669_v53 = vpack.i.bf16 %v1908_v17, %v1889_v54 }
 0xcc4   :  { %v1891_v51 = vpop.f32.mrf.mxu0 }
 0xcc5   :  { %2670 = vrot.lane.b32.xlu1 %v2669_v53, %s3021_s25  ;;  %s3022_s25 = smov [#allocation14]  }
 0xcc6   :  { %s2290_s1 = sshll.u32 %s3022_s25, 4  ;;  %s2291_s1 = int_to_ptr.vmem [resolvable:$true] %s2290_s1 }
 0xcc7   :  { %v1870_v55 = vpop.f32.mrf.mxu3 }
 0xcc8   :  { %v2664_v56 = vpack.i.bf16 %v1870_v55, %v1851_v47 }
 0xcca   :  { %2665 = vrot.lane.b32.xlu2 %v2664_v56, %s3014_s21  ;;  %v1910_v19 = vpop.f32.mrf.mxu1 }
 0xccb   :  { %v2692_v19 = vld [vmem:[%s3700_s8 + $0x1] ss:$0 sm:$0xff] }
 0xccf   :  { %v1872_v57 = vpop.f32.mrf.mxu3 }
 0xd24   :  { %v2666_v0 = vpop.permute.xlu2 %2665 }
 0xd25   :  { %v2668_v4 = vunpack.i.h.bf16 %v2666_v0  ;;  %v2667_v5 = vunpack.i.l.bf16 %v2666_v0 }
 0xd26   :  { %v2661_v61 = vpop.permute.xlu0 %2660 }
 0xd27   :  { %v2663_v62 = vunpack.i.h.bf16 %v2661_v61  ;;  %v2662_v63 = vunpack.i.l.bf16 %v2661_v61 }
 0xd29   :  { %v1937_v1 = vsel %vm372_vm8, %v1794_v41, %v2663_v62  ;;  %v1936_v2 = vsel %vm372_vm8, %v1775_v43, %v2662_v63 }
 0xd2a   :  { %v1938_v14 = vsel %vm933_vm4, %v1936_v2, %v2667_v5  ;;  %v1939_v15 = vsel %vm933_vm4, %v1937_v1, %v2668_v4  ;;  %v2622_v2 = vld [vmem:[%s3704_s12 + $0x78] sm:$0xff]  ;;  %v2621_v4 = vld [vmem:[%s3704_s12 + $0x70] sm:$0xff]  ;;  %v2620_v5 = vld [vmem:[%s3704_s12 + $0x68] sm:$0xff] }
 0xd2b   :  { %2203 = vmatpush.bf16.msrb.mxu0 %v2622_v2 }
 0xd2f   :  { %2204 = vmatpush.bf16.msrb.mxu0 %v2621_v4 }
 0xd33   :  { %2205 = vmatpush.bf16.msrb.mxu0 %v2620_v5 }
 0xd37   :  { %v2671_v9 = vpop.permute.xlu1 %2670 }
 0xd38   :  { %v2673_v12 = vunpack.i.h.bf16 %v2671_v9  ;;  %v2672_v13 = vunpack.i.l.bf16 %v2671_v9  ;;  %v2619_v9 = vld [vmem:[%s3704_s12 + $0x60] sm:$0xff] }
 0xd39   :  { %2206 = vmatpush.bf16.msrb.mxu0 %v2619_v9 }
 0xd3a   :  { %v1940_v7 = vsel %vm936_vm5, %v1938_v14, %v2672_v13  ;;  %v1941_v3 = vsel %vm936_vm5, %v1939_v15, %v2673_v12  ;;  %v2618_v12 = vld [vmem:[%s3704_s12 + $0x58] sm:$0xff]  ;;  %v2617_v13 = vld [vmem:[%s3704_s12 + $0x50] sm:$0xff]  ;;  %v2694_v14 = vld [vmem:[%s3703_s11 + $0x1] ss:$0 sm:$0xff] }
 0xd3b   :  { %v1942_v39 = vpack.c.bf16 %v1941_v3, %v1940_v7  ;;  %v2616_v15 = vld [vmem:[%s3704_s12 + $0x48] sm:$0xff]  ;;  %v2615_v3 = vld [vmem:[%s3704_s12 + $0x40] sm:$0xff] }
 0xd3d   :  { %2504 = vmatmul.msk.bf16.vlgmr.msrb.gmra.mxu2 %vm164_vm0, %v1942_v39  ;;  %2207 = vmatpush.bf16.msrb.mxu0 %v2618_v12 }
 0xd41   :  { %2208 = vmatpush.bf16.msrb.mxu0 %v2617_v13 }
 0xd45   :  { %2209 = vmatpush.bf16.msrb.mxu0 %v2616_v15 }
 0xd49   :  { %2210 = vmatpush.bf16.msrb.mxu0 %v2615_v3 }
 0xdc0   :  { %v1993_v18 = vpop.f32.mrf.mxu2 }
 0xdc1   :  { %v1994_v11 = vadd.f32 %v2691_v16, %v1993_v18 }
 0xdc3   :  { %v1998_v8 = vadd.f32 %v1994_v11, %v3481_v25 }
 0xdc5   :  { %v2004_v20 = vsel %vm164_vm0, %v1998_v8, 0.0 }
 0xdc6   :  { %2005 = vadd.xlane.f32.xlu0 %v2004_v20 }
 0xdc8   :  { %v1995_v21 = vpop.f32.mrf.mxu2 }
 0xdc9   :  { %v1996_v31 = vadd.f32 %v2691_v16, %v1995_v21 }
 0xdcb   :  { %v1999_v22 = vadd.f32 %v1996_v31, %v3483_v26  ;;  %v2614_v26 = vld [vmem:[#allocation11 + $0x38] sm:$0xff] }
 0xdcc   :  { %2104 = vmatpush.bf16.msra.mxu3 %v2614_v26 }
 0xdcd   :  { %v2007_v23 = vsel %vm164_vm0, %v1999_v22, 0.0 }
 0xdce   :  { %2008 = vadd.xlane.f32.xlu2 %v2007_v23 }
 0xdd0   :  { %2105 = vmatpush.bf16.msra.mxu3 %v2613_v37 }
 0xdd4   :  { %2106 = vmatpush.bf16.msra.mxu3 %v2612_v38 }
 0xdd8   :  { %2107 = vmatpush.bf16.msra.mxu3 %v2611_v42 }
 0xe39   :  { %v2006_v24 = vpop.xlane.xlu0 %2005 }
 0xe3a   :  { %v2010_v27 = vmul.f32 %v2006_v24, %v3141_v10 }
 0xe3c   :  { %v2012_v28 = vsub.f32 %v1998_v8, %v2010_v27 }
 0xe3e   :  { %v2014_v30 = vmul.f32 %v2012_v28, %v2012_v28 }
 0xe40   :  { %v2016_v29 = vsel %vm164_vm0, %v2014_v30, 0.0 }
 0xe41   :  { %v2009_v33 = vpop.xlane.xlu2 %2008  ;;  %2017 = vadd.xlane.f32.xlu1 %v2016_v29 }
 0xe42   :  { %v2011_v25 = vmul.f32 %v2009_v33, %v3141_v10 }
 0xe44   :  { %v2013_v49 = vsub.f32 %v1999_v22, %v2011_v25 }
 0xe46   :  { %v2015_v34 = vmul.f32 %v2013_v49, %v2013_v49 }
 0xe48   :  { %v2019_v36 = vsel %vm164_vm0, %v2015_v34, 0.0 }
 0xe49   :  { %2020 = vadd.xlane.f32.xlu0 %v2019_v36 }
 0xeb4   :  { %v2018_v35 = vpop.xlane.xlu1 %2017 }
 0xeb5   :  { %v2022_v40 = vmul.f32 %v2018_v35, %v3141_v10  ;;  %v2695_v35 = vld [vmem:[%s3705_s13 + $0x1] ss:$0 sm:$0xff] }
 0xeb7   :  { %v2024_v41 = vadd.f32 1e-12, %v2022_v40 }
 0xeb9   :  { %2780 = vrsqrt.f32 %v2024_v41  ;;  %vm2032_vm10 = vweird.f32 %v2024_v41 }
 0xebc   :  { %v2021_v43 = vpop.xlane.xlu0 %2020 }
 0xebd   :  { %v2023_v44 = vmul.f32 %v2021_v43, %v3141_v10 }
 0xebf   :  { %v2781_v45 = vpop.eup %2780  ;;  %v2025_v46 = vadd.f32 1e-12, %v2023_v44 }
 0xec0   :  { %v2027_v47 = vmul.f32 %v2781_v45, %v2024_v41  ;;  %vm2033_vm8 = vweird.f32 %v2781_v45 }
 0xec1   :  { %2782 = vrsqrt.f32 %v2025_v46  ;;  %vm2034_vm4 = vmor %vm2032_vm10, %vm2033_vm8  ;;  %vm2042_vm7 = vweird.f32 %v2025_v46 }
 0xec2   :  { %v2028_v48 = vmul.f32 %v2781_v45, %v2027_v47 }
 0xec4   :  { %v2029_v52 = vmul.f32 0.5, %v2028_v48 }
 0xec6   :  { %v2030_v6 = vsub.f32 1.5, %v2029_v52 }
 0xec7   :  { %v2783_v50 = vpop.eup %2782 }
 0xec8   :  { %v2031_v54 = vmul.f32 %v2781_v45, %v2030_v6  ;;  %v2037_v51 = vmul.f32 %v2783_v50, %v2025_v46  ;;  %vm2043_vm5 = vweird.f32 %v2783_v50 }
 0xec9   :  { %vm2044_vm9 = vmor %vm2042_vm7, %vm2043_vm5 }
 0xeca   :  { %v2038_v17 = vmul.f32 %v2783_v50, %v2037_v51  ;;  %v2035_v53 = vsel %vm2034_vm4, %v2781_v45, %v2031_v54 }
 0xecb   :  { %v2046_v57 = vmul.f32 %v2035_v53, %v2012_v28 }
 0xecc   :  { %v2039_v55 = vmul.f32 0.5, %v2038_v17 }
 0xecd   :  { %v2051_v60 = vmul.f32 %v2692_v19, %v2046_v57 }
 0xece   :  { %v2040_v56 = vsub.f32 1.5, %v2039_v55 }
 0xecf   :  { %v2056_v63 = vadd.f32 %v2693_v59, %v2051_v60 }
 0xed0   :  { %v2041_v58 = vmul.f32 %v2783_v50, %v2040_v56 }
 0xed2   :  { %v2045_v32 = vsel %vm2044_vm9, %v2783_v50, %v2041_v58 }
 0xed3   :  { %v2047_v61 = vmul.f32 %v2045_v32, %v2013_v49 }
 0xed5   :  { %v2052_v62 = vmul.f32 %v2692_v19, %v2047_v61 }
 0xed7   :  { %v2057_v0 = vadd.f32 %v2693_v59, %v2052_v62 }
 0xed9   :  { %v2058_v1 = vpack.c.bf16 %v2057_v0, %v2056_v63 }
 0xedb   :  { %2524 = vmatmul.msk.bf16.vlgmr.msra.gmra.mxu3 %vm164_vm0, %v2058_v1 }
 0xf5e   :  { %v2109_v7 = vpop.f32.mrf.mxu3 }
 0xf5f   :  { %v2110_v39 = vadd.f32 %v2694_v14, %v2109_v7 }
 0xf61   :  { %v2114_v16 = vmul.f32 %v2110_v39, %v2110_v39 }
 0xf63   :  { %v2116_v18 = vmul.f32 %v2114_v16, %v2110_v39 }
 0xf65   :  { %v2118_v11 = vmul.f32 0.044715, %v2116_v18  ;;  %v2697_v18 = vld [vmem:[%s3707_s15 + $0x1] ss:$0 sm:$0xff] }
 0xf66   :  { %v2111_v8 = vpop.f32.mrf.mxu3 }
 0xf67   :  { %v2120_v20 = vadd.f32 %v2118_v11, %v2110_v39  ;;  %v2112_v21 = vadd.f32 %v2694_v14, %v2111_v8 }
 0xf69   :  { %v2122_v31 = vmul.f32 0.7978846, %v2120_v20  ;;  %v2115_v22 = vmul.f32 %v2112_v21, %v2112_v21 }
 0xf6b   :  { %v2117_v23 = vmul.f32 %v2115_v22, %v2112_v21  ;;  %2784 = vtanh.f32 %v2122_v31 }
 0xf6d   :  { %v2119_v24 = vmul.f32 0.044715, %v2117_v23 }
 0xf6f   :  { %v2121_v27 = vadd.f32 %v2119_v24, %v2112_v21 }
 0xf71   :  { %v2123_v28 = vmul.f32 0.7978846, %v2121_v27  ;;  %v2785_v30 = vpop.eup %2784 }
 0xf72   :  { %v2126_v29 = vadd.f32 1.0, %v2785_v30 }
 0xf73   :  { %2786 = vtanh.f32 %v2123_v28 }
 0xf74   :  { %v2128_v25 = vmul.f32 0.5, %v2126_v29 }
 0xf76   :  { %v2130_v36 = vmul.f32 %v2128_v25, %v2110_v39 }
 0xf79   :  { %v2787_v33 = vpop.eup %2786 }
 0xf7a   :  { %v2127_v49 = vadd.f32 1.0, %v2787_v33 }
 0xf7c   :  { %v2129_v34 = vmul.f32 0.5, %v2127_v49 }
 0xf7e   :  { %v2131_v26 = vmul.f32 %v2129_v34, %v2112_v21 }
 0xf80   :  { %v2132_v37 = vpack.c.bf16 %v2131_v26, %v2130_v36 }
 0xf82   :  { %2211 = vmatmul.bf16.vlgmr.msrb.gmra.mxu0 %v2132_v37 }
 0xfff   :  { %v2212_v38 = vpop.f32.mrf.mxu0 }
0x1000   :  { %v2213_v40 = vadd.f32 %v2695_v35, %v2212_v38 }
0x1002   :  { %v2217_v41 = vadd.f32 %v2213_v40, %v2056_v63 }
0x1004   :  { %v2223_v42 = vsel %vm164_vm0, %v2217_v41, 0.0 }
0x1005   :  { %2224 = vadd.xlane.f32.xlu0 %v2223_v42 }
0x1007   :  { %v2214_v43 = vpop.f32.mrf.mxu0 }
0x1008   :  { %v2215_v44 = vadd.f32 %v2695_v35, %v2214_v43 }
0x100a   :  { %v2218_v45 = vadd.f32 %v2215_v44, %v2057_v0 }
0x100c   :  { %v2226_v46 = vsel %vm164_vm0, %v2218_v45, 0.0 }
0x100d   :  { %2227 = vadd.xlane.f32.xlu2 %v2226_v46 }
0x1078   :  { %v2225_v47 = vpop.xlane.xlu0 %2224 }
0x1079   :  { %v2229_v48 = vmul.f32 %v2225_v47, %v3141_v10 }
0x107b   :  { %v2231_v52 = vsub.f32 %v2217_v41, %v2229_v48 }
0x107d   :  { %v2233_v6 = vmul.f32 %v2231_v52, %v2231_v52 }
0x107f   :  { %v2235_v50 = vsel %vm164_vm0, %v2233_v6, 0.0 }
0x1080   :  { %v2228_v54 = vpop.xlane.xlu2 %2227  ;;  %2236 = vadd.xlane.f32.xlu2 %v2235_v50 }
0x1081   :  { %v2230_v51 = vmul.f32 %v2228_v54, %v3141_v10 }
0x1083   :  { %v2232_v17 = vsub.f32 %v2218_v45, %v2230_v51 }
0x1085   :  { %v2234_v53 = vmul.f32 %v2232_v17, %v2232_v17 }
0x1087   :  { %v2238_v55 = vsel %vm164_vm0, %v2234_v53, 0.0 }
0x1088   :  { %2239 = vadd.xlane.f32.xlu1 %v2238_v55 }
0x10f3   :  { %v2237_v56 = vpop.xlane.xlu2 %2236 }
0x10f4   :  { %v2241_v19 = vmul.f32 %v2237_v56, %v3141_v10 }
0x10f6   :  { %v2243_v57 = vadd.f32 1e-12, %v2241_v19 }
0x10f8   :  { %2788 = vrsqrt.f32 %v2243_v57  ;;  %vm2251_vm11 = vweird.f32 %v2243_v57 }
0x10fb   :  { %v2240_v58 = vpop.xlane.xlu1 %2239 }
0x10fc   :  { %v2242_v32 = vmul.f32 %v2240_v58, %v3141_v10  ;;  %v2696_v10 = vld [vmem:[#allocation13 + $0x1] ss:$0 sm:$0xff] }
0x10fe   :  { %v2789_v59 = vpop.eup %2788  ;;  %v2244_v60 = vadd.f32 1e-12, %v2242_v32 }
0x10ff   :  { %v2246_v61 = vmul.f32 %v2789_v59, %v2243_v57  ;;  %vm2252_vm0 = vweird.f32 %v2789_v59 }
0x1100   :  { %2790 = vrsqrt.f32 %v2244_v60  ;;  %vm2253_vm12 = vmor %vm2251_vm11, %vm2252_vm0  ;;  %vm2261_vm14 = vweird.f32 %v2244_v60 }
0x1101   :  { %v2247_v62 = vmul.f32 %v2789_v59, %v2246_v61 }
0x1103   :  { %v2248_v63 = vmul.f32 0.5, %v2247_v62 }
0x1105   :  { %v2249_v0 = vsub.f32 1.5, %v2248_v63 }
0x1106   :  { %v2791_v1 = vpop.eup %2790 }
0x1107   :  { %v2256_v2 = vmul.f32 %v2791_v1, %v2244_v60  ;;  %v2250_v4 = vmul.f32 %v2789_v59, %v2249_v0  ;;  %vm2262_vm13 = vweird.f32 %v2791_v1 }
0x1108   :  { %vm2263_vm15 = vmor %vm2261_vm14, %vm2262_vm13 }
0x1109   :  { %v2257_v5 = vmul.f32 %v2791_v1, %v2256_v2  ;;  %v2254_v12 = vsel %vm2253_vm12, %v2789_v59, %v2250_v4 }
0x110a   :  { %v2265_v15 = vmul.f32 %v2254_v12, %v2231_v52 }
0x110b   :  { %v2258_v9 = vmul.f32 0.5, %v2257_v5 }
0x110c   :  { %v2270_v39 = vmul.f32 %v2696_v10, %v2265_v15 }
0x110d   :  { %v2259_v13 = vsub.f32 1.5, %v2258_v9 }
0x110e   :  { %v2275_v8 = vadd.f32 %v2697_v18, %v2270_v39 }
0x110f   :  { %v2260_v14 = vmul.f32 %v2791_v1, %v2259_v13 }
0x1111   :  { %v2264_v7 = vsel %vm2263_vm15, %v2791_v1, %v2260_v14 }
0x1112   :  { %v2266_v3 = vmul.f32 %v2264_v7, %v2232_v17 }
0x1114   :  { %v2271_v16 = vmul.f32 %v2696_v10, %v2266_v3 }
0x1116   :  { %v2276_v11 = vadd.f32 %v2697_v18, %v2271_v16 }
0x1118   :  { %v2279_v20 = vrot.slane %v2276_v11, 7 }
0x111a   :  { %v2281_v21 = vsel %vm2280_vm1, %v2279_v20, %v2275_v8 }
0x111b   :  { %2284 = vst.msk [vmem:[#allocation14] sm:$0x3] %vm2283_vm2, %v2281_v21 }
0x111c   :  { %2295 = dma.vmem_to_hbm [thread:$0]  %s2291_s1, 32, %s2293_s20, [#allocation4]  }
0x111d   :  { %3000 = dma.done.wait [#allocation4], 32  }
0x111e   :  { %3001 = vsyncadd [#allocation4], 4294967264 }
0x111f   :  { %2300 = vsyncpa [#allocation3], 1 }
0x1120   :  { %2301 = vsyncpa [#allocation6], 1 }
0x1121   :  { %2302 = vsyncpa [#allocation9], 1 }
0x1122   :  { %2303 = vsyncpa [#allocation12], 1 }
0x1123   :  { %2304 = vsyncpa [#allocation4], 1 }

</bundles_post_ra>
